<compile_context>
chip_gen: v7x
topology: tpu7x:2x2x1
jax: 0.10.0
libtpu: 0.0.40
codegen_flags: <defaults>
</compile_context>

<pallas_src>
import math
import functools

import jax
import jax.numpy as jnp
from jax.experimental import pallas as pl
from jax.experimental.pallas import tpu as pltpu


def _layer_norm(x, gamma, beta, eps):
    # single-pass variance: E[x^2] - mu^2 (two independent lane reductions)
    mu = jnp.mean(x, axis=-1, keepdims=True)
    ms = jnp.mean(x * x, axis=-1, keepdims=True)
    var = ms - mu * mu
    return (x - mu) * jax.lax.rsqrt(var + eps) * gamma + beta


# ----------------------------------------------------------------------------
# Fused decoder-stack kernel.  One grid step = one decoder layer.
# The output block (constant index across the layer axis) is the resident
# activation carry; it is written back to HBM only after the last layer.
# ----------------------------------------------------------------------------
def gpt_decoder_stack_kernel(
    x_ref, maskb_ref,
    wqkv_ref, bqkv_ref, wo_ref, bo_ref, g1_ref, be1_ref,
    w1_ref, b1_ref, w2_ref, b2_ref, g3_ref, be3_ref,
    o_ref,
    *, n_heads, kdim, vdim, eps):
    layer = pl.program_id(0)
    B, S, D = x_ref.shape
    Hk = n_heads * kdim
    Hv = n_heads * vdim
    M = B * S
    cdt = wqkv_ref.dtype            # streaming / MXU-input dtype (bf16)

    # NOTE: out_specs has a constant block index, so o_ref stays resident in
    # VMEM across the whole layer grid and doubles as the activation carry.
    # Do not change the output index_map without revisiting this.
    @pl.when(layer == 0)
    def _():
        o_ref[...] = x_ref[...]

    x = o_ref[...].reshape(M, D)    # (M, D) f32 activations
    maskb = maskb_ref[...]          # (S, S) additive mask bias (0 / -1e30)

    # ---- fused QKV projection: one wide bf16 MXU matmul, f32 accumulate ----
    # (1/sqrt(kdim) is pre-folded into the Q columns of wqkv / bqkv.)
    qkv = jnp.dot(x.astype(cdt), wqkv_ref[0],
                  preferred_element_type=jnp.float32) + bqkv_ref[0]
    q = qkv[:, :Hk].reshape(B, S, Hk)
    k = qkv[:, Hk:2 * Hk].reshape(B, S, Hk)
    v = qkv[:, 2 * Hk:].reshape(B, S, Hv)

    # ---- per-head scores + softmax + AV, batched over B (f32 math) ----
    heads = []
    for h in range(n_heads):
        qh = q[:, :, h * kdim:(h + 1) * kdim]
        kh = k[:, :, h * kdim:(h + 1) * kdim]
        vh = v[:, :, h * vdim:(h + 1) * vdim]
        s = jnp.einsum('bqk,btk->bqt', qh, kh,
                       preferred_element_type=jnp.float32) + maskb[None]
        m = jnp.max(s, axis=-1, keepdims=True)
        p = jnp.exp(s - m)
        l = jnp.sum(p, axis=-1, keepdims=True)
        inv_l = pl.reciprocal(l, approx=True)        # EUP slot
        inv_l = inv_l * (2.0 - l * inv_l)            # one Newton step
        heads.append(jnp.einsum('bqt,btv->bqv', p * inv_l, vh,
                                preferred_element_type=jnp.float32))

    # ---- output projection: concat(heads) @ Wo (bf16) + ReLU ----
    cat = jnp.concatenate(heads, axis=-1).reshape(M, Hv)
    attn = jnp.maximum(
        jnp.dot(cat.astype(cdt), wo_ref[0],
                preferred_element_type=jnp.float32) + bo_ref[0], 0.0)
    # dropout1: eval-mode identity
    t1 = _layer_norm(x + attn, g1_ref[0], be1_ref[0], eps)

    # ---- feed-forward over flattened rows (bf16 weights, f32 accumulate) ----
    h1 = jnp.maximum(
        jnp.dot(t1.astype(cdt), w1_ref[0],
                preferred_element_type=jnp.float32) + b1_ref[0], 0.0)
    ff = jnp.dot(h1.astype(cdt), w2_ref[0],
                 preferred_element_type=jnp.float32) + b2_ref[0]
    # dropout3: eval-mode identity
    out = _layer_norm(t1 + ff, g3_ref[0], be3_ref[0], eps)

    o_ref[...] = out.reshape(B, S, D)   # carry to next layer (and final output)


# ----------------------------------------------------------------------------
# Positional encoding (exact reproduction of PosEnc.get_pe), shape (S, d_model)
# ----------------------------------------------------------------------------
def get_pe(seq_length, d_model):
    position = jnp.arange(seq_length, dtype=jnp.float32)[:, None]
    div_even = 10.0 ** (4.0 * 2.0 * jnp.arange(0, d_model, 2, dtype=jnp.float32) / d_model)
    div_odd = 10.0 ** (4.0 * 2.0 * jnp.arange(1, d_model, 2, dtype=jnp.float32) / d_model)
    pe = jnp.zeros((seq_length, d_model), jnp.float32)
    pe = pe.at[:, 0::2].set(jnp.sin(position / div_even))
    pe = pe.at[:, 1::2].set(jnp.cos(position / div_odd))
    return pe


# ----------------------------------------------------------------------------
# Weight packing: fold 1/sqrt(kdim) into Q columns, cast big weights to bf16.
# ----------------------------------------------------------------------------
def pack_weights(params, n_heads, weight_dtype=jnp.bfloat16):
    D = params["wqkv"].shape[1]
    kdim = D // n_heads
    Hk = n_heads * kdim
    Hv = params["wo"].shape[1]
    inv_sqrt_k = 1.0 / math.sqrt(kdim)
    col_scale = jnp.concatenate(
        [jnp.full((Hk,), inv_sqrt_k, jnp.float32),
         jnp.ones((Hk + Hv,), jnp.float32)])
    wqkv = (params["wqkv"] * col_scale).astype(weight_dtype)
    bqkv = params["bqkv"] * col_scale                 # biases stay f32
    return (wqkv, bqkv,
            params["wo"].astype(weight_dtype), params["bo"],
            params["g1"], params["be1"],
            params["w1"].astype(weight_dtype), params["b1"],
            params["w2"].astype(weight_dtype), params["b2"],
            params["g3"], params["be3"])


# ----------------------------------------------------------------------------
# Wrapper: embedding gather + positional encoding in plain JAX, then one
# pallas_call over all layers (weights stacked on a leading layer axis).
# ----------------------------------------------------------------------------
def gpt_decoder_forward(tokens, mask, emb, params, *, n_heads, eps=1e-5,
                        weight_buffers=3, weight_dtype=jnp.bfloat16):
    # TODO(synk): embedding lookup + PE add could be folded into the kernel via
    # PrefetchScalarGridSpec + a pl.Element row gather; kept in plain JAX here
    # (data-dependent gather, negligible at B*S=16).
    B, S = tokens.shape
    D = emb.shape[1]
    kdim = D // n_heads
    vdim = params["wo"].shape[1] // n_heads
    L = params["wqkv"].shape[0]

    x = emb[tokens] / math.sqrt(D) + get_pe(S, D)[None]        # (B, S, D) f32
    # top-level dropout: eval-mode identity

    # additive mask bias (finite large-negative; causal mask never fully masks
    # a row, so softmax cannot silently go uniform)
    mask_bias = jnp.where(mask == 0, jnp.float32(-1e30), jnp.float32(0.0))

    weights = pack_weights(params, n_heads, weight_dtype)
    big = {0, 2, 6, 8}   # wqkv, wo, w1, w2: deepen their prefetch pipeline

    def wspec(idx, a):
        shape = (1,) + a.shape[1:]
        imap = lambda l: (l,) + (0,) * (a.ndim - 1)
        if idx in big and weight_buffers is not None and weight_buffers > 2:
            try:
                return pl.BlockSpec(shape, imap,
                                    pipeline_mode=pl.Buffered(weight_buffers))
            except (AttributeError, TypeError):
                pass
        return pl.BlockSpec(shape, imap)

    kernel = functools.partial(gpt_decoder_stack_kernel,
                               n_heads=n_heads, kdim=kdim, vdim=vdim, eps=eps)
    return pl.pallas_call(
        kernel,
        out_shape=jax.ShapeDtypeStruct((B, S, D), jnp.float32),
        grid=(L,),
        in_specs=[pl.BlockSpec((B, S, D), lambda l: (0, 0, 0)),
                  pl.BlockSpec((S, S), lambda l: (0, 0))]
                 + [wspec(i, w) for i, w in enumerate(weights)],
        # constant index -> output block resident across layers (activation carry)
        out_specs=pl.BlockSpec((B, S, D), lambda l: (0, 0, 0)),
        compiler_params=pltpu.CompilerParams(
            dimension_semantics=("arbitrary",),      # sequential layer carry
            vmem_limit_bytes=32 * 1024 * 1024),
    )(x, mask_bias, *weights)


# ----------------------------------------------------------------------------
# Deterministic parameter init (fused / layer-stacked layout, f32 master copy)
# ----------------------------------------------------------------------------
def init_params(key, n_layers, d_model, n_heads, vdim, dff):
    kdim = d_model // n_heads
    Hk = n_heads * kdim
    Hv = n_heads * vdim

    def u(k, shape, fan_in):
        lim = 1.0 / math.sqrt(fan_in)
        return jax.random.uniform(k, shape, jnp.float32, -lim, lim)

    ks = jax.random.split(key, 8)
    return dict(
        wqkv=u(ks[0], (n_layers, d_model, 2 * Hk + Hv), d_model),
        bqkv=u(ks[1], (n_layers, 1, 2 * Hk + Hv), d_model),
        wo=u(ks[2], (n_layers, Hv, d_model), Hv),
        bo=u(ks[3], (n_layers, 1, d_model), Hv),
        g1=jnp.ones((n_layers, 1, d_model), jnp.float32),
        be1=jnp.zeros((n_layers, 1, d_model), jnp.float32),
        w1=u(ks[4], (n_layers, d_model, dff), d_model),
        b1=u(ks[5], (n_layers, 1, dff), d_model),
        w2=u(ks[6], (n_layers, dff, d_model), dff),
        b2=u(ks[7], (n_layers, 1, d_model), dff),
        g3=jnp.ones((n_layers, 1, d_model), jnp.float32),
        be3=jnp.zeros((n_layers, 1, d_model), jnp.float32),
    )


# ----------------------------------------------------------------------------
# Reference 1: plain-JAX replica of the kernel's mixed-precision math
# (same packed bf16 weights, same folded scale) -> tight tolerance check.
# ----------------------------------------------------------------------------
def reference_fused_mixed(x0, mask_bias, weights, *, n_heads, kdim, vdim, eps=1e-5):
    (wqkv, bqkv, wo, bo, g1, be1, w1, b1, w2, b2, g3, be3) = weights
    B, S, D = x0.shape
    Hk = n_heads * kdim
    Hv = n_heads * vdim
    L = wqkv.shape[0]
    cdt = wqkv.dtype
    x = x0.reshape(B * S, D)
    for li in range(L):
        qkv = jnp.dot(x.astype(cdt), wqkv[li],
                      preferred_element_type=jnp.float32) + bqkv[li]
        q = qkv[:, :Hk].reshape(B, S, Hk)
        k = qkv[:, Hk:2 * Hk].reshape(B, S, Hk)
        v = qkv[:, 2 * Hk:].reshape(B, S, Hv)
        heads = []
        for h in range(n_heads):
            qh = q[:, :, h * kdim:(h + 1) * kdim]
            kh = k[:, :, h * kdim:(h + 1) * kdim]
            vh = v[:, :, h * vdim:(h + 1) * vdim]
            s = jnp.einsum('bqk,btk->bqt', qh, kh) + mask_bias[None]
            a = jax.nn.softmax(s, axis=-1)
            heads.append(jnp.einsum('bqt,btv->bqv', a, vh))
        cat = jnp.concatenate(heads, axis=-1).reshape(B * S, Hv)
        attn = jax.nn.relu(jnp.dot(cat.astype(cdt), wo[li],
                                   preferred_element_type=jnp.float32) + bo[li])
        t1 = _layer_norm(x + attn, g1[li], be1[li], eps)
        hd = jax.nn.relu(jnp.dot(t1.astype(cdt), w1[li],
                                 preferred_element_type=jnp.float32) + b1[li])
        ff = jnp.dot(hd.astype(cdt), w2[li],
                     preferred_element_type=jnp.float32) + b2[li]
        x = _layer_norm(t1 + ff, g3[li], be3[li], eps)
    return x.reshape(B, S, D)


# ----------------------------------------------------------------------------
# Reference 2: faithful f32 module forward (mirrors the PyTorch per-head math).
# ----------------------------------------------------------------------------
def reference_module_f32(tokens, mask, emb, p, *, n_heads, eps=1e-5):
    B, S = tokens.shape
    D = emb.shape[1]
    kdim = D // n_heads
    vdim = p["wo"].shape[1] // n_heads
    Hk = n_heads * kdim
    L = p["wqkv"].shape[0]

    x = emb[tokens] / math.sqrt(D) + get_pe(S, D)[None]
    for l in range(L):
        wqkv, bqkv = p["wqkv"][l], p["bqkv"][l][0]
        heads = []
        for h in range(n_heads):
            sq = slice(h * kdim, (h + 1) * kdim)
            sk = slice(Hk + h * kdim, Hk + (h + 1) * kdim)
            sv = slice(2 * Hk + h * vdim, 2 * Hk + (h + 1) * vdim)
            q = x @ wqkv[:, sq] + bqkv[sq]
            k = x @ wqkv[:, sk] + bqkv[sk]
            v = x @ wqkv[:, sv] + bqkv[sv]
            s = jnp.einsum('bsk,btk->bst', q, k)
            s = jnp.where(mask[None] == 0, -jnp.inf, s) / math.sqrt(kdim)
            a = jax.nn.softmax(s, axis=-1)
            heads.append(jnp.einsum('bst,btv->bsv', a, v))
        cat = jnp.concatenate(heads, axis=-1)
        attn = jax.nn.relu(cat @ p["wo"][l] + p["bo"][l][0])
        t1 = _layer_norm(x + attn, p["g1"][l][0], p["be1"][l][0], eps)
        ff = jax.nn.relu(t1 @ p["w1"][l] + p["b1"][l][0]) @ p["w2"][l] + p["b2"][l][0]
        x = _layer_norm(t1 + ff, p["g3"][l][0], p["be3"][l][0], eps)
    return x


if __name__ == "__main__":
    # module defaults (lane-dense: every matmul last dim is a multiple of 128)
    B, S = 2, 8
    d_model, n_heads, vdim, dff = 128, 4, 32, 512
    n_tokens, n_layers = 50, 3
    kdim = d_model // n_heads

    key = jax.random.PRNGKey(0)
    k_emb, k_tok, k_par = jax.random.split(key, 3)
    emb = jax.random.normal(k_emb, (n_tokens, d_model), jnp.float32)  # nn.Embedding ~ N(0,1)
    tokens = jax.random.randint(k_tok, (B, S), 0, n_tokens, dtype=jnp.int32)
    mask = jnp.tril(jnp.ones((S, S), jnp.int32))                      # causal mask
    params = init_params(k_par, n_layers, d_model, n_heads, vdim, dff)

    try:
        out = jax.block_until_ready(
            gpt_decoder_forward(tokens, mask, emb, params, n_heads=n_heads,
                                weight_buffers=3))
    except Exception:
        # fall back to default double-buffering if pl.Buffered / pipeline_mode
        # is unsupported by this jax version
        out = jax.block_until_ready(
            gpt_decoder_forward(tokens, mask, emb, params, n_heads=n_heads,
                                weight_buffers=2))

    assert out.shape == (B, S, d_model)

    # (1) tight check vs. a plain-JAX replica of the kernel's exact mixed-
    #     precision math (validates the Pallas plumbing: specs, carry, grid)
    x0 = emb[tokens] / math.sqrt(d_model) + get_pe(S, d_model)[None]
    mask_bias = jnp.where(mask == 0, jnp.float32(-1e30), jnp.float32(0.0))
    weights = pack_weights(params, n_heads)
    ref_mixed = reference_fused_mixed(x0, mask_bias, weights, n_heads=n_heads,
                                      kdim=kdim, vdim=vdim)
    err_mixed = float(jnp.max(jnp.abs(out - ref_mixed)))
    assert jnp.allclose(out, ref_mixed, rtol=5e-3, atol=5e-3), err_mixed

    # (2) looser check vs. the faithful f32 module forward (bounds the drift
    #     introduced by deliberately streaming weights in bf16)
    ref_f32 = reference_module_f32(tokens, mask, emb, params, n_heads=n_heads)
    err_f32 = float(jnp.max(jnp.abs(out - ref_f32)))
    assert jnp.allclose(out, ref_f32, rtol=5e-2, atol=1e-1), err_f32

    print("KERNEL_OK")
</pallas_src>

<mosaic_0001>
module attributes {stable_mosaic.version = 11 : i64} {
  func.func @gpt_decoder_stack_kernel(%arg0: i32, %arg1: memref<2x8x128xf32, #tpu.memory_space<vmem>>, %arg2: memref<8x8xf32, #tpu.memory_space<vmem>>, %arg3: memref<1x128x384xbf16, #tpu.memory_space<vmem>>, %arg4: memref<1x1x384xf32, #tpu.memory_space<vmem>>, %arg5: memref<1x128x128xbf16, #tpu.memory_space<vmem>>, %arg6: memref<1x1x128xf32, #tpu.memory_space<vmem>>, %arg7: memref<1x1x128xf32, #tpu.memory_space<vmem>>, %arg8: memref<1x1x128xf32, #tpu.memory_space<vmem>>, %arg9: memref<1x128x512xbf16, #tpu.memory_space<vmem>>, %arg10: memref<1x1x512xf32, #tpu.memory_space<vmem>>, %arg11: memref<1x512x128xbf16, #tpu.memory_space<vmem>>, %arg12: memref<1x1x128xf32, #tpu.memory_space<vmem>>, %arg13: memref<1x1x128xf32, #tpu.memory_space<vmem>>, %arg14: memref<1x1x128xf32, #tpu.memory_space<vmem>>, %arg15: memref<2x8x128xf32, #tpu.memory_space<vmem>>) attributes {dimension_semantics = [#tpu.dimension_semantics<arbitrary>], iteration_bounds = array<i64: 3>, scalar_prefetch = 0 : i64, scratch_operands = 0 : i64, tpu.core_type = #tpu.core_type<tc>, window_params = [{pipeline_mode = #tpu.pipeline_mode<synchronous>, transform_indices = @transform_0, window_bounds = array<i64: 2, 8, 128>}, {pipeline_mode = #tpu.pipeline_mode<synchronous>, transform_indices = @transform_1, window_bounds = array<i64: 8, 8>}, {transform_indices = @transform_2, window_bounds = array<i64: 1, 128, 384>}, {transform_indices = @transform_3, window_bounds = array<i64: 1, 1, 384>}, {transform_indices = @transform_4, window_bounds = array<i64: 1, 128, 128>}, {transform_indices = @transform_5, window_bounds = array<i64: 1, 1, 128>}, {transform_indices = @transform_6, window_bounds = array<i64: 1, 1, 128>}, {transform_indices = @transform_7, window_bounds = array<i64: 1, 1, 128>}, {transform_indices = @transform_8, window_bounds = array<i64: 1, 128, 512>}, {transform_indices = @transform_9, window_bounds = array<i64: 1, 1, 512>}, {transform_indices = @transform_10, window_bounds = array<i64: 1, 512, 128>}, {transform_indices = @transform_11, window_bounds = array<i64: 1, 1, 128>}, {transform_indices = @transform_12, window_bounds = array<i64: 1, 1, 128>}, {transform_indices = @transform_13, window_bounds = array<i64: 1, 1, 128>}, {pipeline_mode = #tpu.pipeline_mode<synchronous>, transform_indices = @transform_14, window_bounds = array<i64: 2, 8, 128>}]} {
    %c0_i32 = arith.constant 0 : i32
    %0 = arith.cmpi eq, %arg0, %c0_i32 : i32
    %1 = arith.extui %0 : i1 to i32
    %c0_i32_0 = arith.constant 0 : i32
    %2 = arith.cmpi ne, %1, %c0_i32_0 : i32
    scf.if %2 {
      %c0_79 = arith.constant 0 : index
      %c0_80 = arith.constant 0 : index
      %c0_81 = arith.constant 0 : index
      %194 = vector.load %arg1[%c0_79, %c0_80, %c0_81] : memref<2x8x128xf32, #tpu.memory_space<vmem>>, vector<2x8x128xf32>
      %c0_82 = arith.constant 0 : index
      %c0_83 = arith.constant 0 : index
      %c0_84 = arith.constant 0 : index
      %195 = vector.load %arg15[%c0_82, %c0_83, %c0_84] : memref<2x8x128xf32, #tpu.memory_space<vmem>>, vector<2x8x128xf32>
      tpu.vector_store %arg15[%c0_82, %c0_83, %c0_84], %194 {strides = array<i32>} : memref<2x8x128xf32, #tpu.memory_space<vmem>>, vector<2x8x128xf32>,
    } else {
    }
    %c0 = arith.constant 0 : index
    %c0_1 = arith.constant 0 : index
    %c0_2 = arith.constant 0 : index
    %3 = vector.load %arg15[%c0, %c0_1, %c0_2] : memref<2x8x128xf32, #tpu.memory_space<vmem>>, vector<2x8x128xf32>
    %4 = vector.shape_cast %3 : vector<2x8x128xf32> to vector<16x128xf32>
    %c0_3 = arith.constant 0 : index
    %c0_4 = arith.constant 0 : index
    %5 = vector.load %arg2[%c0_3, %c0_4] : memref<8x8xf32, #tpu.memory_space<vmem>>, vector<8x8xf32>
    %6 = arith.truncf %4 : vector<16x128xf32> to vector<16x128xbf16>
    %c0_5 = arith.constant 0 : index
    %c0_6 = arith.constant 0 : index
    %c0_7 = arith.constant 0 : index
    %7 = vector.load %arg3[%c0_5, %c0_6, %c0_7] : memref<1x128x384xbf16, #tpu.memory_space<vmem>>, vector<1x128x384xbf16>
    %8 = vector.shape_cast %7 : vector<1x128x384xbf16> to vector<128x384xbf16>
    %cst = arith.constant dense<0.000000e+00> : vector<16x384xf32>
    %9 = tpu.matmul %6, %8, %cst {dimension_numbers = #tpu.dot_dimension_numbers<[1], [0], [0], [1], [0, 0, 1, 1], [], []>} : vector<16x128xbf16>, vector<128x384xbf16>, vector<16x384xf32> -> vector<16x384xf32>
    %c0_8 = arith.constant 0 : index
    %c0_9 = arith.constant 0 : index
    %c0_10 = arith.constant 0 : index
    %10 = vector.load %arg4[%c0_8, %c0_9, %c0_10] : memref<1x1x384xf32, #tpu.memory_space<vmem>>, vector<1x1x384xf32>
    %11 = vector.shape_cast %10 : vector<1x1x384xf32> to vector<1x384xf32>
    %12 = vector.broadcast %11 : vector<1x384xf32> to vector<16x384xf32>
    %13 = arith.addf %9, %12 : vector<16x384xf32>
    %14 = vector.extract_strided_slice %13 {offsets = [0, 0], sizes = [16, 128], strides = [1, 1]} : vector<16x384xf32> to vector<16x128xf32>
    %15 = vector.shape_cast %14 : vector<16x128xf32> to vector<2x8x128xf32>
    %16 = vector.extract_strided_slice %13 {offsets = [0, 128], sizes = [16, 128], strides = [1, 1]} : vector<16x384xf32> to vector<16x128xf32>
    %17 = vector.shape_cast %16 : vector<16x128xf32> to vector<2x8x128xf32>
    %18 = vector.extract_strided_slice %13 {offsets = [0, 256], sizes = [16, 128], strides = [1, 1]} : vector<16x384xf32> to vector<16x128xf32>
    %19 = vector.shape_cast %18 : vector<16x128xf32> to vector<2x8x128xf32>
    %20 = vector.extract_strided_slice %15 {offsets = [0, 0, 0], sizes = [2, 8, 32], strides = [1, 1, 1]} : vector<2x8x128xf32> to vector<2x8x32xf32>
    %21 = vector.extract_strided_slice %17 {offsets = [0, 0, 0], sizes = [2, 8, 32], strides = [1, 1, 1]} : vector<2x8x128xf32> to vector<2x8x32xf32>
    %22 = vector.extract_strided_slice %19 {offsets = [0, 0, 0], sizes = [2, 8, 32], strides = [1, 1, 1]} : vector<2x8x128xf32> to vector<2x8x32xf32>
    "tpu.trace_start"() <{level = 10 : i32, message = "bqk,btk->bqt"}> : () -> ()
    %cst_11 = arith.constant dense<0.000000e+00> : vector<2x8x8xf32>
    %23 = tpu.matmul %20, %21, %cst_11 {dimension_numbers = #tpu.dot_dimension_numbers<[2], [2], [1], [1], [0, 0, 0, 1, 1, 1], [0], [0]>} : vector<2x8x32xf32>, vector<2x8x32xf32>, vector<2x8x8xf32> -> vector<2x8x8xf32>
    "tpu.trace_stop"() : () -> ()
    %24 = vector.shape_cast %5 : vector<8x8xf32> to vector<1x8x8xf32>
    %25 = vector.broadcast %24 : vector<1x8x8xf32> to vector<2x8x8xf32>
    %26 = arith.addf %23, %25 : vector<2x8x8xf32>
    %cst_12 = arith.constant dense<0xFF800000> : vector<2x8xf32>
    %27 = vector.multi_reduction <maximumf>, %26, %cst_12 [2] : vector<2x8x8xf32> to vector<2x8xf32>
    %28 = vector.shape_cast %27 : vector<2x8xf32> to vector<2x8x1xf32>
    %29 = vector.broadcast %28 : vector<2x8x1xf32> to vector<2x8x8xf32>
    %30 = arith.subf %26, %29 : vector<2x8x8xf32>
    %31 = math.exp %30 : vector<2x8x8xf32>
    %cst_13 = arith.constant dense<0.000000e+00> : vector<2x8xf32>
    %32 = vector.multi_reduction <add>, %31, %cst_13 [2] : vector<2x8x8xf32> to vector<2x8xf32>
    %33 = vector.shape_cast %32 : vector<2x8xf32> to vector<2x8x1xf32>
    %34 = tpu.reciprocal %33 {approx = true} : vector<2x8x1xf32> -> vector<2x8x1xf32>
    %35 = arith.mulf %33, %34 : vector<2x8x1xf32>
    %cst_14 = arith.constant 2.000000e+00 : f32
    %36 = vector.broadcast %cst_14 : f32 to vector<2x8x1xf32>
    %37 = arith.subf %36, %35 : vector<2x8x1xf32>
    %38 = arith.mulf %34, %37 : vector<2x8x1xf32>
    %39 = vector.broadcast %38 : vector<2x8x1xf32> to vector<2x8x8xf32>
    %40 = arith.mulf %31, %39 : vector<2x8x8xf32>
    "tpu.trace_start"() <{level = 10 : i32, message = "bqt,btv->bqv"}> : () -> ()
    %cst_15 = arith.constant dense<0.000000e+00> : vector<2x8x32xf32>
    %41 = tpu.matmul %40, %22, %cst_15 {dimension_numbers = #tpu.dot_dimension_numbers<[2], [1], [1], [2], [0, 0, 0, 1, 1, 2], [0], [0]>} : vector<2x8x8xf32>, vector<2x8x32xf32>, vector<2x8x32xf32> -> vector<2x8x32xf32>
    "tpu.trace_stop"() : () -> ()
    %42 = vector.extract_strided_slice %15 {offsets = [0, 0, 32], sizes = [2, 8, 32], strides = [1, 1, 1]} : vector<2x8x128xf32> to vector<2x8x32xf32>
    %43 = vector.extract_strided_slice %17 {offsets = [0, 0, 32], sizes = [2, 8, 32], strides = [1, 1, 1]} : vector<2x8x128xf32> to vector<2x8x32xf32>
    %44 = vector.extract_strided_slice %19 {offsets = [0, 0, 32], sizes = [2, 8, 32], strides = [1, 1, 1]} : vector<2x8x128xf32> to vector<2x8x32xf32>
    "tpu.trace_start"() <{level = 10 : i32, message = "bqk,btk->bqt"}> : () -> ()
    %cst_16 = arith.constant dense<0.000000e+00> : vector<2x8x8xf32>
    %45 = tpu.matmul %42, %43, %cst_16 {dimension_numbers = #tpu.dot_dimension_numbers<[2], [2], [1], [1], [0, 0, 0, 1, 1, 1], [0], [0]>} : vector<2x8x32xf32>, vector<2x8x32xf32>, vector<2x8x8xf32> -> vector<2x8x8xf32>
    "tpu.trace_stop"() : () -> ()
    %46 = vector.shape_cast %5 : vector<8x8xf32> to vector<1x8x8xf32>
    %47 = vector.broadcast %46 : vector<1x8x8xf32> to vector<2x8x8xf32>
    %48 = arith.addf %45, %47 : vector<2x8x8xf32>
    %cst_17 = arith.constant dense<0xFF800000> : vector<2x8xf32>
    %49 = vector.multi_reduction <maximumf>, %48, %cst_17 [2] : vector<2x8x8xf32> to vector<2x8xf32>
    %50 = vector.shape_cast %49 : vector<2x8xf32> to vector<2x8x1xf32>
    %51 = vector.broadcast %50 : vector<2x8x1xf32> to vector<2x8x8xf32>
    %52 = arith.subf %48, %51 : vector<2x8x8xf32>
    %53 = math.exp %52 : vector<2x8x8xf32>
    %cst_18 = arith.constant dense<0.000000e+00> : vector<2x8xf32>
    %54 = vector.multi_reduction <add>, %53, %cst_18 [2] : vector<2x8x8xf32> to vector<2x8xf32>
    %55 = vector.shape_cast %54 : vector<2x8xf32> to vector<2x8x1xf32>
    %56 = tpu.reciprocal %55 {approx = true} : vector<2x8x1xf32> -> vector<2x8x1xf32>
    %57 = arith.mulf %55, %56 : vector<2x8x1xf32>
    %cst_19 = arith.constant 2.000000e+00 : f32
    %58 = vector.broadcast %cst_19 : f32 to vector<2x8x1xf32>
    %59 = arith.subf %58, %57 : vector<2x8x1xf32>
    %60 = arith.mulf %56, %59 : vector<2x8x1xf32>
    %61 = vector.broadcast %60 : vector<2x8x1xf32> to vector<2x8x8xf32>
    %62 = arith.mulf %53, %61 : vector<2x8x8xf32>
    "tpu.trace_start"() <{level = 10 : i32, message = "bqt,btv->bqv"}> : () -> ()
    %cst_20 = arith.constant dense<0.000000e+00> : vector<2x8x32xf32>
    %63 = tpu.matmul %62, %44, %cst_20 {dimension_numbers = #tpu.dot_dimension_numbers<[2], [1], [1], [2], [0, 0, 0, 1, 1, 2], [0], [0]>} : vector<2x8x8xf32>, vector<2x8x32xf32>, vector<2x8x32xf32> -> vector<2x8x32xf32>
    "tpu.trace_stop"() : () -> ()
    %64 = vector.extract_strided_slice %15 {offsets = [0, 0, 64], sizes = [2, 8, 32], strides = [1, 1, 1]} : vector<2x8x128xf32> to vector<2x8x32xf32>
    %65 = vector.extract_strided_slice %17 {offsets = [0, 0, 64], sizes = [2, 8, 32], strides = [1, 1, 1]} : vector<2x8x128xf32> to vector<2x8x32xf32>
    %66 = vector.extract_strided_slice %19 {offsets = [0, 0, 64], sizes = [2, 8, 32], strides = [1, 1, 1]} : vector<2x8x128xf32> to vector<2x8x32xf32>
    "tpu.trace_start"() <{level = 10 : i32, message = "bqk,btk->bqt"}> : () -> ()
    %cst_21 = arith.constant dense<0.000000e+00> : vector<2x8x8xf32>
    %67 = tpu.matmul %64, %65, %cst_21 {dimension_numbers = #tpu.dot_dimension_numbers<[2], [2], [1], [1], [0, 0, 0, 1, 1, 1], [0], [0]>} : vector<2x8x32xf32>, vector<2x8x32xf32>, vector<2x8x8xf32> -> vector<2x8x8xf32>
    "tpu.trace_stop"() : () -> ()
    %68 = vector.shape_cast %5 : vector<8x8xf32> to vector<1x8x8xf32>
    %69 = vector.broadcast %68 : vector<1x8x8xf32> to vector<2x8x8xf32>
    %70 = arith.addf %67, %69 : vector<2x8x8xf32>
    %cst_22 = arith.constant dense<0xFF800000> : vector<2x8xf32>
    %71 = vector.multi_reduction <maximumf>, %70, %cst_22 [2] : vector<2x8x8xf32> to vector<2x8xf32>
    %72 = vector.shape_cast %71 : vector<2x8xf32> to vector<2x8x1xf32>
    %73 = vector.broadcast %72 : vector<2x8x1xf32> to vector<2x8x8xf32>
    %74 = arith.subf %70, %73 : vector<2x8x8xf32>
    %75 = math.exp %74 : vector<2x8x8xf32>
    %cst_23 = arith.constant dense<0.000000e+00> : vector<2x8xf32>
    %76 = vector.multi_reduction <add>, %75, %cst_23 [2] : vector<2x8x8xf32> to vector<2x8xf32>
    %77 = vector.shape_cast %76 : vector<2x8xf32> to vector<2x8x1xf32>
    %78 = tpu.reciprocal %77 {approx = true} : vector<2x8x1xf32> -> vector<2x8x1xf32>
    %79 = arith.mulf %77, %78 : vector<2x8x1xf32>
    %cst_24 = arith.constant 2.000000e+00 : f32
    %80 = vector.broadcast %cst_24 : f32 to vector<2x8x1xf32>
    %81 = arith.subf %80, %79 : vector<2x8x1xf32>
    %82 = arith.mulf %78, %81 : vector<2x8x1xf32>
    %83 = vector.broadcast %82 : vector<2x8x1xf32> to vector<2x8x8xf32>
    %84 = arith.mulf %75, %83 : vector<2x8x8xf32>
    "tpu.trace_start"() <{level = 10 : i32, message = "bqt,btv->bqv"}> : () -> ()
    %cst_25 = arith.constant dense<0.000000e+00> : vector<2x8x32xf32>
    %85 = tpu.matmul %84, %66, %cst_25 {dimension_numbers = #tpu.dot_dimension_numbers<[2], [1], [1], [2], [0, 0, 0, 1, 1, 2], [0], [0]>} : vector<2x8x8xf32>, vector<2x8x32xf32>, vector<2x8x32xf32> -> vector<2x8x32xf32>
    "tpu.trace_stop"() : () -> ()
    %86 = vector.extract_strided_slice %15 {offsets = [0, 0, 96], sizes = [2, 8, 32], strides = [1, 1, 1]} : vector<2x8x128xf32> to vector<2x8x32xf32>
    %87 = vector.extract_strided_slice %17 {offsets = [0, 0, 96], sizes = [2, 8, 32], strides = [1, 1, 1]} : vector<2x8x128xf32> to vector<2x8x32xf32>
    %88 = vector.extract_strided_slice %19 {offsets = [0, 0, 96], sizes = [2, 8, 32], strides = [1, 1, 1]} : vector<2x8x128xf32> to vector<2x8x32xf32>
    "tpu.trace_start"() <{level = 10 : i32, message = "bqk,btk->bqt"}> : () -> ()
    %cst_26 = arith.constant dense<0.000000e+00> : vector<2x8x8xf32>
    %89 = tpu.matmul %86, %87, %cst_26 {dimension_numbers = #tpu.dot_dimension_numbers<[2], [2], [1], [1], [0, 0, 0, 1, 1, 1], [0], [0]>} : vector<2x8x32xf32>, vector<2x8x32xf32>, vector<2x8x8xf32> -> vector<2x8x8xf32>
    "tpu.trace_stop"() : () -> ()
    %90 = vector.shape_cast %5 : vector<8x8xf32> to vector<1x8x8xf32>
    %91 = vector.broadcast %90 : vector<1x8x8xf32> to vector<2x8x8xf32>
    %92 = arith.addf %89, %91 : vector<2x8x8xf32>
    %cst_27 = arith.constant dense<0xFF800000> : vector<2x8xf32>
    %93 = vector.multi_reduction <maximumf>, %92, %cst_27 [2] : vector<2x8x8xf32> to vector<2x8xf32>
    %94 = vector.shape_cast %93 : vector<2x8xf32> to vector<2x8x1xf32>
    %95 = vector.broadcast %94 : vector<2x8x1xf32> to vector<2x8x8xf32>
    %96 = arith.subf %92, %95 : vector<2x8x8xf32>
    %97 = math.exp %96 : vector<2x8x8xf32>
    %cst_28 = arith.constant dense<0.000000e+00> : vector<2x8xf32>
    %98 = vector.multi_reduction <add>, %97, %cst_28 [2] : vector<2x8x8xf32> to vector<2x8xf32>
    %99 = vector.shape_cast %98 : vector<2x8xf32> to vector<2x8x1xf32>
    %100 = tpu.reciprocal %99 {approx = true} : vector<2x8x1xf32> -> vector<2x8x1xf32>
    %101 = arith.mulf %99, %100 : vector<2x8x1xf32>
    %cst_29 = arith.constant 2.000000e+00 : f32
    %102 = vector.broadcast %cst_29 : f32 to vector<2x8x1xf32>
    %103 = arith.subf %102, %101 : vector<2x8x1xf32>
    %104 = arith.mulf %100, %103 : vector<2x8x1xf32>
    %105 = vector.broadcast %104 : vector<2x8x1xf32> to vector<2x8x8xf32>
    %106 = arith.mulf %97, %105 : vector<2x8x8xf32>
    "tpu.trace_start"() <{level = 10 : i32, message = "bqt,btv->bqv"}> : () -> ()
    %cst_30 = arith.constant dense<0.000000e+00> : vector<2x8x32xf32>
    %107 = tpu.matmul %106, %88, %cst_30 {dimension_numbers = #tpu.dot_dimension_numbers<[2], [1], [1], [2], [0, 0, 0, 1, 1, 2], [0], [0]>} : vector<2x8x8xf32>, vector<2x8x32xf32>, vector<2x8x32xf32> -> vector<2x8x32xf32>
    "tpu.trace_stop"() : () -> ()
    %108 = tpu.concatenate %41, %63, %85, %107 in 2 : vector<2x8x32xf32>, vector<2x8x32xf32>, vector<2x8x32xf32>, vector<2x8x32xf32> -> vector<2x8x128xf32>
    %109 = vector.shape_cast %108 : vector<2x8x128xf32> to vector<16x128xf32>
    %110 = arith.truncf %109 : vector<16x128xf32> to vector<16x128xbf16>
    %c0_31 = arith.constant 0 : index
    %c0_32 = arith.constant 0 : index
    %c0_33 = arith.constant 0 : index
    %111 = vector.load %arg5[%c0_31, %c0_32, %c0_33] : memref<1x128x128xbf16, #tpu.memory_space<vmem>>, vector<1x128x128xbf16>
    %112 = vector.shape_cast %111 : vector<1x128x128xbf16> to vector<128x128xbf16>
    %cst_34 = arith.constant dense<0.000000e+00> : vector<16x128xf32>
    %113 = tpu.matmul %110, %112, %cst_34 {dimension_numbers = #tpu.dot_dimension_numbers<[1], [0], [0], [1], [0, 0, 1, 1], [], []>} : vector<16x128xbf16>, vector<128x128xbf16>, vector<16x128xf32> -> vector<16x128xf32>
    %c0_35 = arith.constant 0 : index
    %c0_36 = arith.constant 0 : index
    %c0_37 = arith.constant 0 : index
    %114 = vector.load %arg6[%c0_35, %c0_36, %c0_37] : memref<1x1x128xf32, #tpu.memory_space<vmem>>, vector<1x1x128xf32>
    %115 = vector.shape_cast %114 : vector<1x1x128xf32> to vector<1x128xf32>
    %116 = vector.broadcast %115 : vector<1x128xf32> to vector<16x128xf32>
    %117 = arith.addf %113, %116 : vector<16x128xf32>
    %cst_38 = arith.constant 0.000000e+00 : f32
    %118 = vector.broadcast %cst_38 : f32 to vector<16x128xf32>
    %119 = arith.maximumf %117, %118 : vector<16x128xf32>
    %120 = arith.addf %4, %119 : vector<16x128xf32>
    %c0_39 = arith.constant 0 : index
    %c0_40 = arith.constant 0 : index
    %c0_41 = arith.constant 0 : index
    %121 = vector.load %arg7[%c0_39, %c0_40, %c0_41] : memref<1x1x128xf32, #tpu.memory_space<vmem>>, vector<1x1x128xf32>
    %122 = vector.shape_cast %121 : vector<1x1x128xf32> to vector<1x128xf32>
    %c0_42 = arith.constant 0 : index
    %c0_43 = arith.constant 0 : index
    %c0_44 = arith.constant 0 : index
    %123 = vector.load %arg8[%c0_42, %c0_43, %c0_44] : memref<1x1x128xf32, #tpu.memory_space<vmem>>, vector<1x1x128xf32>
    %124 = vector.shape_cast %123 : vector<1x1x128xf32> to vector<1x128xf32>
    %cst_45 = arith.constant dense<0.000000e+00> : vector<16xf32>
    %125 = vector.multi_reduction <add>, %120, %cst_45 [1] : vector<16x128xf32> to vector<16xf32>
    %126 = vector.shape_cast %125 : vector<16xf32> to vector<16x1xf32>
    %cst_46 = arith.constant 1.280000e+02 : f32
    %127 = vector.broadcast %cst_46 : f32 to vector<16x1xf32>
    %128 = arith.divf %126, %127 : vector<16x1xf32>
    %129 = arith.mulf %120, %120 : vector<16x128xf32>
    %cst_47 = arith.constant dense<0.000000e+00> : vector<16xf32>
    %130 = vector.multi_reduction <add>, %129, %cst_47 [1] : vector<16x128xf32> to vector<16xf32>
    %131 = vector.shape_cast %130 : vector<16xf32> to vector<16x1xf32>
    %cst_48 = arith.constant 1.280000e+02 : f32
    %132 = vector.broadcast %cst_48 : f32 to vector<16x1xf32>
    %133 = arith.divf %131, %132 : vector<16x1xf32>
    %134 = arith.mulf %128, %128 : vector<16x1xf32>
    %135 = arith.subf %133, %134 : vector<16x1xf32>
    %136 = vector.broadcast %128 : vector<16x1xf32> to vector<16x128xf32>
    %137 = arith.subf %120, %136 : vector<16x128xf32>
    %cst_49 = arith.constant 9.99999974E-6 : f32
    %138 = vector.broadcast %cst_49 : f32 to vector<16x1xf32>
    %139 = arith.addf %135, %138 : vector<16x1xf32>
    %140 = math.rsqrt %139 : vector<16x1xf32>
    %141 = vector.broadcast %140 : vector<16x1xf32> to vector<16x128xf32>
    %142 = arith.mulf %137, %141 : vector<16x128xf32>
    %143 = vector.broadcast %122 : vector<1x128xf32> to vector<16x128xf32>
    %144 = arith.mulf %142, %143 : vector<16x128xf32>
    %145 = vector.broadcast %124 : vector<1x128xf32> to vector<16x128xf32>
    %146 = arith.addf %144, %145 : vector<16x128xf32>
    %147 = arith.truncf %146 : vector<16x128xf32> to vector<16x128xbf16>
    %c0_50 = arith.constant 0 : index
    %c0_51 = arith.constant 0 : index
    %c0_52 = arith.constant 0 : index
    %148 = vector.load %arg9[%c0_50, %c0_51, %c0_52] : memref<1x128x512xbf16, #tpu.memory_space<vmem>>, vector<1x128x512xbf16>
    %149 = vector.shape_cast %148 : vector<1x128x512xbf16> to vector<128x512xbf16>
    %cst_53 = arith.constant dense<0.000000e+00> : vector<16x512xf32>
    %150 = tpu.matmul %147, %149, %cst_53 {dimension_numbers = #tpu.dot_dimension_numbers<[1], [0], [0], [1], [0, 0, 1, 1], [], []>} : vector<16x128xbf16>, vector<128x512xbf16>, vector<16x512xf32> -> vector<16x512xf32>
    %c0_54 = arith.constant 0 : index
    %c0_55 = arith.constant 0 : index
    %c0_56 = arith.constant 0 : index
    %151 = vector.load %arg10[%c0_54, %c0_55, %c0_56] : memref<1x1x512xf32, #tpu.memory_space<vmem>>, vector<1x1x512xf32>
    %152 = vector.shape_cast %151 : vector<1x1x512xf32> to vector<1x512xf32>
    %153 = vector.broadcast %152 : vector<1x512xf32> to vector<16x512xf32>
    %154 = arith.addf %150, %153 : vector<16x512xf32>
    %cst_57 = arith.constant 0.000000e+00 : f32
    %155 = vector.broadcast %cst_57 : f32 to vector<16x512xf32>
    %156 = arith.maximumf %154, %155 : vector<16x512xf32>
    %157 = arith.truncf %156 : vector<16x512xf32> to vector<16x512xbf16>
    %c0_58 = arith.constant 0 : index
    %c0_59 = arith.constant 0 : index
    %c0_60 = arith.constant 0 : index
    %158 = vector.load %arg11[%c0_58, %c0_59, %c0_60] : memref<1x512x128xbf16, #tpu.memory_space<vmem>>, vector<1x512x128xbf16>
    %159 = vector.shape_cast %158 : vector<1x512x128xbf16> to vector<512x128xbf16>
    %cst_61 = arith.constant dense<0.000000e+00> : vector<16x128xf32>
    %160 = tpu.matmul %157, %159, %cst_61 {dimension_numbers = #tpu.dot_dimension_numbers<[1], [0], [0], [1], [0, 0, 1, 1], [], []>} : vector<16x512xbf16>, vector<512x128xbf16>, vector<16x128xf32> -> vector<16x128xf32>
    %c0_62 = arith.constant 0 : index
    %c0_63 = arith.constant 0 : index
    %c0_64 = arith.constant 0 : index
    %161 = vector.load %arg12[%c0_62, %c0_63, %c0_64] : memref<1x1x128xf32, #tpu.memory_space<vmem>>, vector<1x1x128xf32>
    %162 = vector.shape_cast %161 : vector<1x1x128xf32> to vector<1x128xf32>
    %163 = vector.broadcast %162 : vector<1x128xf32> to vector<16x128xf32>
    %164 = arith.addf %160, %163 : vector<16x128xf32>
    %165 = arith.addf %146, %164 : vector<16x128xf32>
    %c0_65 = arith.constant 0 : index
    %c0_66 = arith.constant 0 : index
    %c0_67 = arith.constant 0 : index
    %166 = vector.load %arg13[%c0_65, %c0_66, %c0_67] : memref<1x1x128xf32, #tpu.memory_space<vmem>>, vector<1x1x128xf32>
    %167 = vector.shape_cast %166 : vector<1x1x128xf32> to vector<1x128xf32>
    %c0_68 = arith.constant 0 : index
    %c0_69 = arith.constant 0 : index
    %c0_70 = arith.constant 0 : index
    %168 = vector.load %arg14[%c0_68, %c0_69, %c0_70] : memref<1x1x128xf32, #tpu.memory_space<vmem>>, vector<1x1x128xf32>
    %169 = vector.shape_cast %168 : vector<1x1x128xf32> to vector<1x128xf32>
    %cst_71 = arith.constant dense<0.000000e+00> : vector<16xf32>
    %170 = vector.multi_reduction <add>, %165, %cst_71 [1] : vector<16x128xf32> to vector<16xf32>
    %171 = vector.shape_cast %170 : vector<16xf32> to vector<16x1xf32>
    %cst_72 = arith.constant 1.280000e+02 : f32
    %172 = vector.broadcast %cst_72 : f32 to vector<16x1xf32>
    %173 = arith.divf %171, %172 : vector<16x1xf32>
    %174 = arith.mulf %165, %165 : vector<16x128xf32>
    %cst_73 = arith.constant dense<0.000000e+00> : vector<16xf32>
    %175 = vector.multi_reduction <add>, %174, %cst_73 [1] : vector<16x128xf32> to vector<16xf32>
    %176 = vector.shape_cast %175 : vector<16xf32> to vector<16x1xf32>
    %cst_74 = arith.constant 1.280000e+02 : f32
    %177 = vector.broadcast %cst_74 : f32 to vector<16x1xf32>
    %178 = arith.divf %176, %177 : vector<16x1xf32>
    %179 = arith.mulf %173, %173 : vector<16x1xf32>
    %180 = arith.subf %178, %179 : vector<16x1xf32>
    %181 = vector.broadcast %173 : vector<16x1xf32> to vector<16x128xf32>
    %182 = arith.subf %165, %181 : vector<16x128xf32>
    %cst_75 = arith.constant 9.99999974E-6 : f32
    %183 = vector.broadcast %cst_75 : f32 to vector<16x1xf32>
    %184 = arith.addf %180, %183 : vector<16x1xf32>
    %185 = math.rsqrt %184 : vector<16x1xf32>
    %186 = vector.broadcast %185 : vector<16x1xf32> to vector<16x128xf32>
    %187 = arith.mulf %182, %186 : vector<16x128xf32>
    %188 = vector.broadcast %167 : vector<1x128xf32> to vector<16x128xf32>
    %189 = arith.mulf %187, %188 : vector<16x128xf32>
    %190 = vector.broadcast %169 : vector<1x128xf32> to vector<16x128xf32>
    %191 = arith.addf %189, %190 : vector<16x128xf32>
    %192 = vector.shape_cast %191 : vector<16x128xf32> to vector<2x8x128xf32>
    %c0_76 = arith.constant 0 : index
    %c0_77 = arith.constant 0 : index
    %c0_78 = arith.constant 0 : index
    %193 = vector.load %arg15[%c0_76, %c0_77, %c0_78] : memref<2x8x128xf32, #tpu.memory_space<vmem>>, vector<2x8x128xf32>
    tpu.vector_store %arg15[%c0_76, %c0_77, %c0_78], %192 {strides = array<i32>} : memref<2x8x128xf32, #tpu.memory_space<vmem>>, vector<2x8x128xf32>,
    return
  }
  func.func @transform_0(%arg0: i32) -> (i32, i32, i32) {
    %c0_i32 = arith.constant 0 : i32
    %c0_i32_0 = arith.constant 0 : i32
    %c0_i32_1 = arith.constant 0 : i32
    %c0_i32_2 = arith.constant 0 : i32
    return %c0_i32, %c0_i32_0, %c0_i32_1 : i32, i32, i32
  }
  func.func @transform_1(%arg0: i32) -> (i32, i32) {
    %c0_i32 = arith.constant 0 : i32
    %c0_i32_0 = arith.constant 0 : i32
    %c0_i32_1 = arith.constant 0 : i32
    return %c0_i32, %c0_i32_0 : i32, i32
  }
  func.func @transform_2(%arg0: i32) -> (i32, i32, i32) {
    %c0_i32 = arith.constant 0 : i32
    %c0_i32_0 = arith.constant 0 : i32
    %c0_i32_1 = arith.constant 0 : i32
    return %arg0, %c0_i32, %c0_i32_0 : i32, i32, i32
  }
  func.func @transform_3(%arg0: i32) -> (i32, i32, i32) {
    %c0_i32 = arith.constant 0 : i32
    %c0_i32_0 = arith.constant 0 : i32
    %c0_i32_1 = arith.constant 0 : i32
    return %arg0, %c0_i32, %c0_i32_0 : i32, i32, i32
  }
  func.func @transform_4(%arg0: i32) -> (i32, i32, i32) {
    %c0_i32 = arith.constant 0 : i32
    %c0_i32_0 = arith.constant 0 : i32
    %c0_i32_1 = arith.constant 0 : i32
    return %arg0, %c0_i32, %c0_i32_0 : i32, i32, i32
  }
  func.func @transform_5(%arg0: i32) -> (i32, i32, i32) {
    %c0_i32 = arith.constant 0 : i32
    %c0_i32_0 = arith.constant 0 : i32
    %c0_i32_1 = arith.constant 0 : i32
    return %arg0, %c0_i32, %c0_i32_0 : i32, i32, i32
  }
  func.func @transform_6(%arg0: i32) -> (i32, i32, i32) {
    %c0_i32 = arith.constant 0 : i32
    %c0_i32_0 = arith.constant 0 : i32
    %c0_i32_1 = arith.constant 0 : i32
    return %arg0, %c0_i32, %c0_i32_0 : i32, i32, i32
  }
  func.func @transform_7(%arg0: i32) -> (i32, i32, i32) {
    %c0_i32 = arith.constant 0 : i32
    %c0_i32_0 = arith.constant 0 : i32
    %c0_i32_1 = arith.constant 0 : i32
    return %arg0, %c0_i32, %c0_i32_0 : i32, i32, i32
  }
  func.func @transform_8(%arg0: i32) -> (i32, i32, i32) {
    %c0_i32 = arith.constant 0 : i32
    %c0_i32_0 = arith.constant 0 : i32
    %c0_i32_1 = arith.constant 0 : i32
    return %arg0, %c0_i32, %c0_i32_0 : i32, i32, i32
  }
  func.func @transform_9(%arg0: i32) -> (i32, i32, i32) {
    %c0_i32 = arith.constant 0 : i32
    %c0_i32_0 = arith.constant 0 : i32
    %c0_i32_1 = arith.constant 0 : i32
    return %arg0, %c0_i32, %c0_i32_0 : i32, i32, i32
  }
  func.func @transform_10(%arg0: i32) -> (i32, i32, i32) {
    %c0_i32 = arith.constant 0 : i32
    %c0_i32_0 = arith.constant 0 : i32
    %c0_i32_1 = arith.constant 0 : i32
    return %arg0, %c0_i32, %c0_i32_0 : i32, i32, i32
  }
  func.func @transform_11(%arg0: i32) -> (i32, i32, i32) {
    %c0_i32 = arith.constant 0 : i32
    %c0_i32_0 = arith.constant 0 : i32
    %c0_i32_1 = arith.constant 0 : i32
    return %arg0, %c0_i32, %c0_i32_0 : i32, i32, i32
  }
  func.func @transform_12(%arg0: i32) -> (i32, i32, i32) {
    %c0_i32 = arith.constant 0 : i32
    %c0_i32_0 = arith.constant 0 : i32
    %c0_i32_1 = arith.constant 0 : i32
    return %arg0, %c0_i32, %c0_i32_0 : i32, i32, i32
  }
  func.func @transform_13(%arg0: i32) -> (i32, i32, i32) {
    %c0_i32 = arith.constant 0 : i32
    %c0_i32_0 = arith.constant 0 : i32
    %c0_i32_1 = arith.constant 0 : i32
    return %arg0, %c0_i32, %c0_i32_0 : i32, i32, i32
  }
  func.func @transform_14(%arg0: i32) -> (i32, i32, i32) {
    %c0_i32 = arith.constant 0 : i32
    %c0_i32_0 = arith.constant 0 : i32
    %c0_i32_1 = arith.constant 0 : i32
    %c0_i32_2 = arith.constant 0 : i32
    return %c0_i32, %c0_i32_0, %c0_i32_1 : i32, i32, i32
  }
}

</mosaic_0001>

<bundles_post_ra>
// kernel: tpu_custom_call.1
= control target key start
LH: loop header
LB: loop body
LE: loop exit
PB: predicated region body
PF: predicated region fallthrough
CT: control target
= control target key end

     0   :  { %s5353_s0 = inlined_call_operand.hbm [shape: f32[2,8,128], index: 0, kind: input, shape index: {}]   ;;  %s5354_s1 = inlined_call_operand.hbm [shape: f32[8,8], index: 1, kind: input, shape index: {}]   ;;  %s5355_s2 = inlined_call_operand.hbm [shape: bf16[3,128,384], index: 2, kind: input, shape index: {}]   ;;  %s5356_s3 = inlined_call_operand.vmem [shape: f32[3,1,384], index: 3, kind: input, shape index: {}]   ;;  %s5357_s4 = inlined_call_operand.hbm [shape: bf16[3,128,128], index: 4, kind: input, shape index: {}]   ;;  %s5358_s5 = inlined_call_operand.hbm [shape: f32[3,1,128], index: 5, kind: input, shape index: {}]   ;;  %s5359_s6 = inlined_call_operand.hbm [shape: f32[3,1,128], index: 6, kind: input, shape index: {}]   ;;  %s5360_s7 = inlined_call_operand.vmem [shape: f32[3,1,128], index: 7, kind: input, shape index: {}]   ;;  %s5361_s8 = inlined_call_operand.hbm [shape: bf16[3,128,512], index: 8, kind: input, shape index: {}]   ;;  %s5362_s9 = inlined_call_operand.vmem [shape: f32[3,1,512], index: 9, kind: input, shape index: {}]   ;;  %s5363_s10 = inlined_call_operand.hbm [shape: bf16[3,512,128], index: 10, kind: input, shape index: {}]   ;;  %s5364_s11 = inlined_call_operand.vmem [shape: f32[3,1,128], index: 11, kind: input, shape index: {}]   ;;  %s5365_s12 = inlined_call_operand.vmem [shape: f32[3,1,128], index: 12, kind: input, shape index: {}]   ;;  %s5366_s13 = inlined_call_operand.vmem [shape: f32[3,1,128], index: 13, kind: input, shape index: {}]   ;;  %s5367_s14 = inlined_call_operand.hbm [shape: f32[2,8,128], index: 14, kind: output, shape index: {}]  }
   0x1   :  { %5386 = sst [smem:[#allocation21_spill]] %s5353_s0 }
   0x2   :  { %5387 = sst [smem:[#allocation22_spill]] %s5354_s1 }
   0x3   :  { %5388 = sst [smem:[#allocation23_spill]] %s5355_s2 }
   0x4   :  { %5389 = sst [smem:[#allocation24_spill]] %s5356_s3 }
   0x5   :  { %5390 = sst [smem:[#allocation25_spill]] %s5357_s4 }
   0x6   :  { %5391 = sst [smem:[#allocation26_spill]] %s5358_s5 }
   0x7   :  { %5392 = sst [smem:[#allocation27_spill]] %s5359_s6 }
   0x8   :  { %5393 = sst [smem:[#allocation28_spill]] %s5360_s7 }
   0x9   :  { %5394 = sst [smem:[#allocation29_spill]] %s5362_s9 }
   0xa   :  { %5395 = sst [smem:[#allocation30_spill]] %s5364_s11 }
   0xb   :  { %5396 = sst [smem:[#allocation31_spill]] %s5365_s12 }
   0xc   :  { %5397 = sst [smem:[#allocation32_spill]] %s5366_s13 }
   0xd   :  { %5398 = sst [smem:[#allocation33_spill]] %s5367_s14 }
   0xe   :  { %19 = vsyncpa [#allocation3], 0 }
   0xf   :  { %20 = vsyncpa [#allocation6], 0 }
  0x10   :  { %21 = vsyncpa [#allocation4], 0  ;;  %s4575_s29 = smov 0   ;;  %s4577_s30 = smov 0  }
  0x11   :  { %s4579_s15 = smov 0   ;;  %s4581_s16 = smov 0  }
  0x12 LB: > { %5399 = sst [smem:[#allocation18_spill]] %s4469_s15  ;;  %s4594_s17 = sadd.s32 4294967295, %s4473_s16   ;;  %s4473_s16 = sphi %s4581_s16, %s5445_s16   ;;  %s4469_s15 = sphi %s4579_s15, %s5447_s15   ;;  %s4465_s30 = sphi %s4577_s30, %s5449_s30   ;;  %s4461_s29 = sphi %s4575_s29, %s5448_s29  }
  0x13   : > { %s4597_s18 = sadd.s32 1, %s4473_s16   ;;  %s76_s20 = sadd.s32 1, %s4469_s15 }
  0x14   : > { %5400 = sst [smem:[#allocation19_spill]] %s4597_s18  ;;  %s73_s19 = ssub.s32 %s4473_s16, %s4597_s18 }
  0x15   : > { %p74_p0 = scmp.eq.s32.totalorder %s73_s19, 0  ;;  %p83_p1 = scmp.ne.s32.totalorder %s4469_s15, %s4465_s30 }
  0x16   : > { %p84_p2 = scmp.eq.s32.totalorder %s4473_s16, 0  ;;  %p89_p3 = scmp.ne.s32.totalorder %s4465_s30, %s4461_s29 }
  0x17   : > { %s4607_s21 = scalar_select %p74_p0, %s4469_s15, %s76_s20  }
  0x18   : > { %p4609_p4 = por %p84_p2, %p83_p1  ;;  %p5372_p5 = scmp.eq.s32.totalorder %s4594_s17, 0 }
  0x19   : > { %5401 = sst [smem:[#allocation20_spill]] %s4607_s21  ;;  %p3507_p6 = scmp.ge.s32.totalorder %s4473_s16, 1 }
  0x1a   : > { %p407_p7 = scmp.lt.s32.totalorder %s4473_s16, 4  ;;  %p4618_p8 = por %p5372_p5, %p89_p3 }
  0x1b   : > { %s4475_s25 = smov [#allocation2]   ;;  %p3934_p13 = scmp.lt.s32.totalorder %s4473_s16, 3 }
  0x1c   : > { %s5403_s23 = scalar_select %p4618_p8, 1, 0 }
  0x1d   : > { %p4623_p10 = pnand %p3507_p6, %p407_p7  ;;  %s419_s26 = sshll.u32 %s4475_s25, 4  ;;  %s420_s26 = int_to_ptr.vmem [resolvable:$true] %s419_s26 }
  0x1e   : > { %s4638_s29 = sand.u32 1, %s4469_s15   ;;  %p4642_p0 = pnand %p3934_p13, %p4609_p4 }
  0x1f   : > { %s5404_s24 = scalar_select %p4623_p10, 1, 0 }
  0x20   : > { %p3906_p11 = pneg %p4623_p10  ;;  %s5407_s0 = sld [smem:[#allocation21_spill]] }
  0x21   : > { %s5406_s19 = scalar_select %p4642_p0, 1, 0 }
  0x22   : > { %p4631_p12 = pnand %p3906_p11, %p5372_p5 }
  0x24   : > { %s5405_s27 = scalar_select %p4631_p12, 1, 0 }
  0x25   : > { %p5376_p2 = pneg %p4631_p12 }
  0x26   : > { %s4165_s21 = scalar_lea.hbm %s5407_s0, 256 }
  0x27   : > { %p4166_p1 = scmp.ne.s32.totalorder %s5407_s0, %s4165_s21  ;;  %p4172_p4 = scmp.lt.u32.totalorder %s4165_s21, %s5407_s0 }
  0x29   : > { %p4168_p3 = pnand %p5376_p2, %p4166_p1 }
  0x2b   : > { %p4169_p6 = pneg %p4168_p3 }
  0x2d   : > { %p4174_p7 = pnand %p4172_p4, %p4169_p6 }
  0x2f   : > { %4177 = shalt.err (!%p4174_p7)
}
  0x30   : > { %s4178_s15 = scalar_lea.vmem %s420_s26, 256  ;;  %p4186_p5 = scmp.lt.s32.totalorder %s420_s26, %s420_s26 }
  0x31   : > { %p4179_p11 = scmp.ne.s32.totalorder %s420_s26, %s4178_s15  ;;  %p4187_p8 = scmp.lt.s32.totalorder %s4178_s15, %s4178_s15 }
  0x33   : > { %p4181_p13 = pnand %p4179_p11, %p5376_p2  ;;  %p4188_p10 = por %p4187_p8, %p4186_p5 }
  0x35   : > { %p4182_p9 = pneg %p4181_p13 }
  0x37   : > { %p4189_p0 = pnand %p4188_p10, %p4182_p9 }
  0x39   : > { %4192 = shalt.err (!%p4189_p0)
}
  0x3a   : > { %s4476_s14 = smov 128   ;;  %s4477_s18 = smov 8  }
  0x3b   : > { %3909 = dma.hbm_to_vmem [thread:$0]  (!%p4631_p12), %s5407_s0, 256, %s420_s26, [#allocation3], %s4476_s14, %s4476_s14, %s4477_s18  }
  0x3c   : > { %s3878_s20 = smul.u32 192, %s4638_s29  ;;  %s3512_s22 = sshll.u32 %s4638_s29, 6 }
  0x3d   : > { %s3879_s25 = smul.u32 3072, %s4473_s16  ;;  %s5408_s2 = sld [smem:[#allocation23_spill]] }
  0x3e   : > { %s448_s9 = scalar_lea.vmem [#allocation7], %s3878_s20  ;;  %s5409_s11 = sand.u32 1, %s4473_s16  }
  0x3f   : > { %s455_s3 = sshll.u32 %s448_s9, 4  ;;  %s4680_s7 = scalar_lea.sflag [#allocation3], %s5409_s11  ;;  %s4676_s3 = int_to_ptr.vmem [resolvable:$true] %s455_s3 }
  0x40   : > { %p5410_p8 = scmp.ne.s32.totalorder %s5406_s19, 0 }
  0x42   : > { %p4686_p9 = pneg %p5410_p8 }
  0x43   : > { %s4674_s12 = scalar_lea.hbm %s5408_s2, %s3879_s25  ;;  %s4198_s9 = scalar_lea.hbm %s5408_s2, 9216 }
  0x44   : > { %s4193_s26 = scalar_lea.hbm %s4674_s12, 3072  ;;  %p4199_p1 = scmp.lt.u32.totalorder %s4674_s12, %s5408_s2 }
  0x45   : > { %p4194_p5 = scmp.ne.s32.totalorder %s4674_s12, %s4193_s26  ;;  %p4200_p3 = scmp.lt.u32.totalorder %s4198_s9, %s4193_s26 }
  0x46   : > { %s5411_s14 = scalar_select %p4686_p9, 1, 0 }
  0x47   : > { %p4196_p10 = pnand %p4686_p9, %p4194_p5  ;;  %p4201_p6 = por %p4200_p3, %p4199_p1 }
  0x48   : > { %p4202_p4 = scmp.lt.u32.totalorder %s4193_s26, %s4674_s12 }
  0x49   : > { %p4197_p0 = pneg %p4196_p10 }
  0x4a   : > { %p4203_p7 = por %p4202_p4, %p4201_p6 }
  0x4c   : > { %p4204_p11 = pnand %p4203_p7, %p4197_p0 }
  0x4e   : > { %4207 = shalt.err (!%p4204_p11)
}
  0x4f   : > { %s4208_s11 = scalar_lea.vmem %s4676_s3, 3072  ;;  %s4478_s20 = smov [#allocation7]  }
  0x50   : > { %p4209_p13 = scmp.ne.s32.totalorder %s4676_s3, %s4208_s11  ;;  %s4213_s25 = sshll.u32 %s4478_s20, 4  ;;  %s4214_s25 = int_to_ptr.vmem [resolvable:$false] %s4213_s25 }
  0x51   : > { %s4215_s15 = scalar_lea.vmem %s4214_s25, 6144  ;;  %p4216_p2 = scmp.lt.s32.totalorder %s4676_s3, %s4214_s25 }
  0x52   : > { %p4211_p5 = pnand %p4209_p13, %p4686_p9  ;;  %p4217_p12 = scmp.lt.s32.totalorder %s4215_s15, %s4208_s11 }
  0x54   : > { %p4212_p10 = pneg %p4211_p5  ;;  %p4218_p1 = por %p4217_p12, %p4216_p2 }
  0x56   : > { %p4219_p3 = pnand %p4218_p1, %p4212_p10 }
  0x58   : > { %4222 = shalt.err (!%p4219_p3)
}
  0x59   : > { %s4479_s26 = smov 192   ;;  %s4480_s13 = smov 12  }
  0x5a   : > { %3916 = dma.hbm_to_vmem [thread:$0]  (!%p5410_p8), %s4674_s12, 3072, %s4676_s3, %s4680_s7, %s4479_s26, %s4479_s26, %s4480_s13  }
  0x5b   : > { %s3661_s18 = sshll.u32 %s4473_s16, 10  ;;  %s476_s9 = scalar_lea.vmem [#allocation8], %s3512_s22 }
  0x5c   : > { %s483_s21 = sshll.u32 %s476_s9, 4  ;;  %s5412_s4 = sld [smem:[#allocation25_spill]]  ;;  %s4718_s21 = int_to_ptr.vmem [resolvable:$true] %s483_s21 }
  0x62   : > { %s4716_s20 = scalar_lea.hbm %s5412_s4, %s3661_s18  ;;  %s4228_s22 = scalar_lea.hbm %s5412_s4, 3072 }
  0x63   : > { %s4223_s25 = scalar_lea.hbm %s4716_s20, 1024  ;;  %p4229_p6 = scmp.lt.u32.totalorder %s4716_s20, %s5412_s4 }
  0x64   : > { %p4224_p12 = scmp.ne.s32.totalorder %s4716_s20, %s4223_s25  ;;  %p4230_p4 = scmp.lt.u32.totalorder %s4228_s22, %s4223_s25 }
  0x65   : > { %p4232_p11 = scmp.lt.u32.totalorder %s4223_s25, %s4716_s20 }
  0x66   : > { %p4226_p2 = pnand %p4224_p12, %p4686_p9  ;;  %p4231_p7 = por %p4230_p4, %p4229_p6 }
  0x68   : > { %p4227_p0 = pneg %p4226_p2  ;;  %p4233_p13 = por %p4232_p11, %p4231_p7 }
  0x6a   : > { %p4234_p5 = pnand %p4233_p13, %p4227_p0 }
  0x6c   : > { %4237 = shalt.err (!%p4234_p5)
}
  0x6d   : > { %s4238_s13 = scalar_lea.vmem %s4718_s21, 1024  ;;  %s4481_s18 = smov [#allocation8]  }
  0x6e   : > { %p4239_p10 = scmp.ne.s32.totalorder %s4718_s21, %s4238_s13  ;;  %s4243_s9 = sshll.u32 %s4481_s18, 4  ;;  %s4244_s9 = int_to_ptr.vmem [resolvable:$false] %s4243_s9 }
  0x6f   : > { %s4245_s28 = scalar_lea.vmem %s4244_s9, 2048  ;;  %p4246_p12 = scmp.lt.s32.totalorder %s4718_s21, %s4244_s9 }
  0x70   : > { %p4241_p1 = pnand %p4239_p10, %p4686_p9  ;;  %p4247_p2 = scmp.lt.s32.totalorder %s4245_s28, %s4238_s13 }
  0x72   : > { %p4242_p3 = pneg %p4241_p1  ;;  %p4248_p6 = por %p4247_p2, %p4246_p12 }
  0x74   : > { %p4249_p4 = pnand %p4248_p6, %p4242_p3 }
  0x76   : > { %4252 = shalt.err (!%p4249_p4)
}
  0x77   : > { %s5379_s11 = smov 64   ;;  %s5381_s25 = smov 4  }
  0x78   : > { %3919 = dma.hbm_to_vmem [thread:$0]  (!%p5410_p8), %s4716_s20, 1024, %s4718_s21, %s4680_s7, %s5379_s11, %s5379_s11, %s5381_s25  }
  0x79   : > { %s3515_s3 = sshll.u32 %s4473_s16, 4  ;;  %s5413_s5 = sld [smem:[#allocation26_spill]] }
  0x7a   : > { %s496_s26 = scalar_lea.vmem [#allocation9], %s4638_s29 }
  0x7b   : > { %s503_s13 = sshll.u32 %s496_s26, 4  ;;  %s504_s13 = int_to_ptr.vmem [resolvable:$true] %s503_s13 }
  0x7f   : > { %s4751_s15 = scalar_lea.hbm %s5413_s5, %s3515_s3  ;;  %s4258_s9 = scalar_lea.hbm %s5413_s5, 48 }
  0x80   : > { %s4253_s18 = scalar_lea.hbm %s4751_s15, 16  ;;  %p4259_p13 = scmp.lt.u32.totalorder %s4751_s15, %s5413_s5 }
  0x81   : > { %p4254_p0 = scmp.ne.s32.totalorder %s4751_s15, %s4253_s18  ;;  %p4260_p5 = scmp.lt.u32.totalorder %s4258_s9, %s4253_s18 }
  0x82   : > { %p4262_p1 = scmp.lt.u32.totalorder %s4253_s18, %s4751_s15 }
  0x83   : > { %p4256_p7 = pnand %p4254_p0, %p4686_p9  ;;  %p4261_p10 = por %p4260_p5, %p4259_p13 }
  0x85   : > { %p4257_p11 = pneg %p4256_p7  ;;  %p4263_p3 = por %p4262_p1, %p4261_p10 }
  0x87   : > { %p4264_p12 = pnand %p4263_p3, %p4257_p11 }
  0x89   : > { %4267 = shalt.err (!%p4264_p12)
}
  0x8a   : > { %s4268_s22 = scalar_lea.vmem %s504_s13, 16  ;;  %s4484_s26 = smov [#allocation9]  }
  0x8b   : > { %p4269_p2 = scmp.ne.s32.totalorder %s504_s13, %s4268_s22  ;;  %s4273_s11 = sshll.u32 %s4484_s26, 4  ;;  %s4274_s11 = int_to_ptr.vmem [resolvable:$false] %s4273_s11 }
  0x8c   : > { %s4275_s21 = scalar_lea.vmem %s4274_s11, 32  ;;  %p4276_p0 = scmp.lt.s32.totalorder %s504_s13, %s4274_s11 }
  0x8d   : > { %p4271_p6 = pnand %p4269_p2, %p4686_p9  ;;  %p4277_p7 = scmp.lt.s32.totalorder %s4275_s21, %s4268_s22 }
  0x8f   : > { %p4272_p4 = pneg %p4271_p6  ;;  %p4278_p8 = por %p4277_p7, %p4276_p0 }
  0x91   : > { %p4279_p5 = pnand %p4278_p8, %p4272_p4 }
  0x93   : > { %4282 = shalt.err (!%p4279_p5)
}
  0x94   : > { %p5414_p13 = scmp.ne.s32.totalorder %s5406_s19, 0  ;;  %s5415_s6 = sld [smem:[#allocation27_spill]] }
  0x95   : > { %s513_s11 = scalar_lea.vmem [#allocation10], %s4638_s29  ;;  %s5382_s12 = sshll.u32 %s4638_s29, 8 }
  0x96   : > { %3922 = dma.hbm_to_vmem [thread:$0]  (!%p5414_p13), %s4751_s15, 16, %s504_s13, %s4680_s7  }
  0x97   : > { %s520_s28 = sshll.u32 %s513_s11, 4  ;;  %s521_s28 = int_to_ptr.vmem [resolvable:$true] %s520_s28 }
  0x9a   : > { %s4777_s9 = scalar_lea.hbm %s5415_s6, %s3515_s3  ;;  %s4288_s26 = scalar_lea.hbm %s5415_s6, 48 }
  0x9b   : > { %s4283_s22 = scalar_lea.hbm %s4777_s9, 16  ;;  %p4289_p1 = scmp.lt.u32.totalorder %s4777_s9, %s5415_s6 }
  0x9c   : > { %p4284_p8 = scmp.ne.s32.totalorder %s4777_s9, %s4283_s22  ;;  %p4290_p3 = scmp.lt.u32.totalorder %s4288_s26, %s4283_s22 }
  0x9d   : > { %p4292_p2 = scmp.lt.u32.totalorder %s4283_s22, %s4777_s9 }
  0x9e   : > { %p4286_p11 = pnand %p4284_p8, %p4686_p9  ;;  %p4291_p12 = por %p4290_p3, %p4289_p1 }
  0xa0   : > { %p4287_p10 = pneg %p4286_p11  ;;  %p4293_p6 = por %p4292_p2, %p4291_p12 }
  0xa2   : > { %p4294_p4 = pnand %p4293_p6, %p4287_p10 }
  0xa4   : > { %4297 = shalt.err (!%p4294_p4)
}
  0xa5   : > { %s4298_s18 = scalar_lea.vmem %s521_s28, 16  ;;  %s4485_s20 = smov [#allocation10]  }
  0xa6   : > { %p4299_p0 = scmp.ne.s32.totalorder %s521_s28, %s4298_s18  ;;  %s4303_s11 = sshll.u32 %s4485_s20, 4  ;;  %s4304_s11 = int_to_ptr.vmem [resolvable:$false] %s4303_s11 }
  0xa7   : > { %s4305_s15 = scalar_lea.vmem %s4304_s11, 32  ;;  %p4306_p8 = scmp.lt.s32.totalorder %s521_s28, %s4304_s11 }
  0xa8   : > { %p4301_p7 = pnand %p4299_p0, %p4686_p9  ;;  %p4307_p11 = scmp.lt.s32.totalorder %s4305_s15, %s4298_s18 }
  0xaa   : > { %p4302_p5 = pneg %p4301_p7  ;;  %p4308_p13 = por %p4307_p11, %p4306_p8 }
  0xac   : > { %p4309_p1 = pnand %p4308_p13, %p4302_p5 }
  0xae   : > { %4312 = shalt.err (!%p4309_p1)
}
  0xaf   : > { %p5416_p3 = scmp.ne.s32.totalorder %s5406_s19, 0  ;;  %s3662_s22 = sshll.u32 %s4473_s16, 12 }
  0xb0   : > { %s4805_s21 = scalar_lea.hbm %s5361_s8, %s3662_s22  ;;  %s537_s3 = scalar_lea.vmem [#allocation11], %s5382_s12 }
  0xb1   : > { %3925 = dma.hbm_to_vmem [thread:$0]  (!%p5416_p3), %s4777_s9, 16, %s521_s28, %s4680_s7  }
  0xb2   : > { %s544_s18 = sshll.u32 %s537_s3, 4  ;;  %s4313_s20 = scalar_lea.hbm %s4805_s21, 4096  ;;  %s4809_s18 = int_to_ptr.vmem [resolvable:$true] %s544_s18 }
  0xb3   : > { %p4314_p13 = scmp.ne.s32.totalorder %s4805_s21, %s4313_s20  ;;  %s4318_s11 = scalar_lea.hbm %s5361_s8, 12288 }
  0xb4   : > { %p4319_p2 = scmp.lt.u32.totalorder %s4805_s21, %s5361_s8  ;;  %p4320_p6 = scmp.lt.u32.totalorder %s4318_s11, %s4313_s20 }
  0xb5   : > { %p4316_p10 = pnand %p4314_p13, %p4686_p9  ;;  %p4322_p0 = scmp.lt.u32.totalorder %s4313_s20, %s4805_s21 }
  0xb6   : > { %p4321_p4 = por %p4320_p6, %p4319_p2 }
  0xb7   : > { %p4317_p12 = pneg %p4316_p10 }
  0xb8   : > { %p4323_p7 = por %p4322_p0, %p4321_p4 }
  0xba   : > { %p4324_p5 = pnand %p4323_p7, %p4317_p12 }
  0xbc   : > { %4327 = shalt.err (!%p4324_p5)
}
  0xbd   : > { %s4328_s26 = scalar_lea.vmem %s4809_s18, 4096  ;;  %s4486_s3 = smov [#allocation11]  }
  0xbe   : > { %p4329_p8 = scmp.ne.s32.totalorder %s4809_s18, %s4328_s26  ;;  %s4333_s9 = sshll.u32 %s4486_s3, 4  ;;  %s4334_s9 = int_to_ptr.vmem [resolvable:$false] %s4333_s9 }
  0xbf   : > { %s4335_s28 = scalar_lea.vmem %s4334_s9, 8192  ;;  %p4336_p13 = scmp.lt.s32.totalorder %s4809_s18, %s4334_s9 }
  0xc0   : > { %p4331_p11 = pnand %p4329_p8, %p4686_p9  ;;  %p4337_p10 = scmp.lt.s32.totalorder %s4335_s28, %s4328_s26 }
  0xc2   : > { %p4332_p1 = pneg %p4331_p11  ;;  %p4338_p2 = por %p4337_p10, %p4336_p13 }
  0xc4   : > { %p4339_p6 = pnand %p4338_p2, %p4332_p1 }
  0xc6   : > { %4342 = shalt.err (!%p4339_p6)
}
  0xc7   : > { %s4487_s20 = smov 256   ;;  %s4488_s11 = smov 16  }
  0xc8   : > { %3928 = dma.hbm_to_vmem [thread:$0]  (!%p5416_p3), %s4805_s21, 4096, %s4809_s18, %s4680_s7, %s4487_s20, %s4487_s20, %s4488_s11  }
  0xc9   : > { %s4489_s15 = smov [#allocation5]   ;;  %s4838_s26 = scalar_lea.hbm %s5363_s10, %s3662_s22 }
  0xca   : > { %s433_s13 = sshll.u32 %s4489_s15, 4  ;;  %s5417_s1 = sld [smem:[#allocation22_spill]]  ;;  %s434_s13 = int_to_ptr.vmem [resolvable:$true] %s433_s13 }
  0xcb   : > { %p5418_p4 = scmp.ne.s32.totalorder %s5405_s27, 0 }
  0xcd   : > { %p5419_p0 = pneg %p5418_p4 }
  0xd0   : > { %s4343_s12 = scalar_lea.hbm %s5417_s1, 128 }
  0xd1   : > { %p4344_p12 = scmp.ne.s32.totalorder %s5417_s1, %s4343_s12  ;;  %p4350_p8 = scmp.lt.u32.totalorder %s4343_s12, %s5417_s1 }
  0xd3   : > { %p4346_p7 = pnand %p4344_p12, %p5419_p0 }
  0xd5   : > { %p4347_p5 = pneg %p4346_p7 }
  0xd7   : > { %p4352_p11 = pnand %p4350_p8, %p4347_p5 }
  0xd9   : > { %4355 = shalt.err (!%p4352_p11)
}
  0xda   : > { %s4356_s16 = scalar_lea.vmem %s434_s13, 128  ;;  %p5420_p13 = pmov %p5419_p0 }
  0xdb   : > { %p4357_p1 = scmp.ne.s32.totalorder %s434_s13, %s4356_s16  ;;  %p4364_p6 = scmp.lt.s32.totalorder %s434_s13, %s434_s13 }
  0xdc   : > { %p4365_p3 = scmp.lt.s32.totalorder %s4356_s16, %s4356_s16 }
  0xdd   : > { %p4359_p10 = pnand %p4357_p1, %p5420_p13 }
  0xde   : > { %p4366_p9 = por %p4365_p3, %p4364_p6 }
  0xdf   : > { %p4360_p2 = pneg %p4359_p10 }
  0xe1   : > { %p4367_p0 = pnand %p4366_p9, %p4360_p2 }
  0xe3   : > { %4370 = shalt.err (!%p4367_p0)
}
  0xe4   : > { %3912 = dma.hbm_to_vmem [thread:$0]  (!%p5418_p4), %s5417_s1, 128, %s434_s13, [#allocation6]  }
  0xe5   : > { %s5421_s25 = sshll.u32 %s4638_s29, 8  ;;  %s4371_s20 = scalar_lea.hbm %s4838_s26, 4096 }
  0xe6   : > { %s565_s12 = scalar_lea.vmem [#allocation12], %s5421_s25  ;;  %p4372_p9 = scmp.ne.s32.totalorder %s4838_s26, %s4371_s20 }
  0xe7   : > { %s572_s22 = sshll.u32 %s565_s12, 4  ;;  %p5422_p3 = scmp.ne.s32.totalorder %s5411_s14, 0  ;;  %s4862_s22 = int_to_ptr.vmem [resolvable:$true] %s572_s22 }
  0xe8   : > { %s4376_s15 = scalar_lea.hbm %s5363_s10, 12288  ;;  %p4377_p5 = scmp.lt.u32.totalorder %s4838_s26, %s5363_s10 }
  0xe9   : > { %p4374_p12 = pnand %p4372_p9, %p5422_p3  ;;  %p4378_p8 = scmp.lt.u32.totalorder %s4376_s15, %s4371_s20 }
  0xea   : > { %p4380_p11 = scmp.lt.u32.totalorder %s4371_s20, %s4838_s26 }
  0xeb   : > { %p4375_p7 = pneg %p4374_p12  ;;  %p4379_p4 = por %p4378_p8, %p4377_p5 }
  0xed   : > { %p4381_p1 = por %p4380_p11, %p4379_p4 }
  0xef   : > { %p4382_p13 = pnand %p4381_p1, %p4375_p7 }
  0xf1   : > { %4385 = shalt.err (!%p4382_p13)
}
  0xf2   : > { %s4386_s29 = scalar_lea.vmem %s4862_s22, 4096  ;;  %s4490_s13 = smov [#allocation12]  }
  0xf3   : > { %p4387_p10 = scmp.ne.s32.totalorder %s4862_s22, %s4386_s29  ;;  %s4391_s28 = sshll.u32 %s4490_s13, 4  ;;  %s4392_s28 = int_to_ptr.vmem [resolvable:$false] %s4391_s28 }
  0xf4   : > { %s4393_s21 = scalar_lea.vmem %s4392_s28, 8192  ;;  %p4394_p0 = scmp.lt.s32.totalorder %s4862_s22, %s4392_s28 }
  0xf5   : > { %p4389_p2 = pnand %p4387_p10, %p5422_p3  ;;  %p4395_p9 = scmp.lt.s32.totalorder %s4393_s21, %s4386_s29 }
  0xf7   : > { %p4390_p6 = pneg %p4389_p2  ;;  %p4396_p12 = por %p4395_p9, %p4394_p0 }
  0xf9   : > { %p4397_p5 = pnand %p4396_p12, %p4390_p6 }
  0xfb   : > { %4400 = shalt.err (!%p4397_p5)
}
  0xfc   : > { %p5423_p7 = scmp.ne.s32.totalorder %s5406_s19, 0  ;;  %s5424_s18 = smov 4  }
  0xfd   : > { %s5425_s16 = smov 64   ;;  %p5426_p3 = scmp.ne.s32.totalorder %s5404_s24, 0 }
  0xfe   : > { %3931 = dma.hbm_to_vmem [thread:$0]  (!%p5423_p7), %s4838_s26, 4096, %s4862_s22, %s4680_s7, %s5425_s16, %s5425_s16, %s5424_s18  }
  0xff   : > { %602 = sbr.rel (%p5426_p3) target bundleno = 4071 (0xfe7), region = 76  ;;  %p5427_p8 = scmp.eq.s32.totalorder (!%p5426_p3), %s4594_s17, 0 }
 0x106   : > { %4444 = dma.done.wait (%p5427_p8), [#allocation3], 256   ;;  %p5428_p4 = pmov %p5427_p8 }
 0x108   : > { %4446 = vsyncadd (%p5428_p4), [#allocation3], 4294967040  ;;  %p5429_p11 = pmov %p5428_p4 }
 0x109   : > { %p5430_p1 = pmov %p5428_p4 }
 0x10a   : > { %4448 = dma.done.wait (%p5429_p11), [#allocation6], 128  }
 0x10b   : > { %4450 = vsyncadd (%p5430_p1), [#allocation6], 4294967168  ;;  %s612_s19 = sand.u32 1, %s4594_s17   ;;  %s4901_s7 = sand.u32 1, %s4465_s30  }
 0x10c   : > { %s3880_s24 = smul.u32 192, %s4901_s7  ;;  %s613_s14 = scalar_lea.sflag [#allocation3], %s612_s19 }
 0x10d   : > { %p5431_p13 = scmp.ne.s32.totalorder %s5403_s23, 0 }
 0x10e   : > { %s4904_s26 = scalar_lea.vmem [#allocation7], %s3880_s24 }
 0x10f   : > { %4452 = dma.done.wait (%p5431_p13), %s613_s14, 12320  }
 0x110   : > { %4454 = vsyncadd (%p5431_p13), %s613_s14, 4294954976  ;;  %s3526_s0 = sshll.u32 %s4901_s7, 6  ;;  %s3527_s2 = sshll.u32 %s4901_s7, 8 }
 0x111   : > { %p742_p10 = scmp.lt.s32.totalorder %s4594_s17, 2  ;;  %s5433_s9 = sld [smem:[#allocation30_spill]] }
 0x112   : > { %s5434_s21 = sld [smem:[#allocation24_spill]]  ;;  %s5435_s24 = sld [smem:[#allocation29_spill]] }
 0x113   : > { %s4914_s25 = scalar_select %p742_p10, %s4594_s17, 2 }
 0x114   : > { %s5436_s5 = sld [smem:[#allocation31_spill]]  ;;  %s5437_s27 = sld [smem:[#allocation32_spill]] }
 0x115   : > { %s3881_s12 = smul.u32 3, %s4914_s25  ;;  %s3529_s11 = sshll.u32 %s4914_s25, 2 }
 0x116   : > { %s4944_s15 = scalar_lea.vmem [#allocation8], %s3526_s0  ;;  %s633_s3 = scalar_lea.vmem [#allocation9], %s4901_s7 }
 0x117   : > { %s755_s29 = scalar_lea.vmem %s5433_s9, %s4914_s25  ;;  %s641_s9 = scalar_lea.vmem [#allocation10], %s4901_s7 }
 0x118   : > { %s4929_s18 = scalar_lea.vmem %s5434_s21, %s3881_s12  ;;  %s4934_s14 = scalar_lea.vmem %s5435_s24, %s3529_s11 }
 0x119   : > { %s4948_s13 = scalar_lea.vmem [#allocation11], %s3527_s2  ;;  %s4950_s12 = scalar_lea.vmem [#allocation12], %s3527_s2 }
 0x11a   : > { %s758_s23 = scalar_lea.vmem %s5436_s5, %s4914_s25  ;;  %s761_s6 = scalar_lea.vmem %s5437_s27, %s4914_s25 }
 0x11b   : > { %p5438_p2 = scmp.ne.s32.totalorder %s4594_s17, 0 }
 0x11c   : > { %v767_v0 = vld [vmem:[#allocation2] sm:$0xff] (!%p5438_p2)  ;;  %v768_v1 = vld [vmem:[#allocation2 + $0x8] sm:$0xff] (!%p5438_p2) }
 0x11d   : > { %766 = sbr.rel (%p5438_p2) target bundleno = 292 (0x124), region = 112  ;;  %769 = vst [vmem:[#allocation13] sm:$0xff] (!%p5438_p2), %v767_v0  ;;  %770 = vst [vmem:[#allocation13 + $0x8] sm:$0xff] (!%p5438_p2), %v768_v1 }
 0x124 PF: > { %v4005_v2 = vld [vmem:[%s4904_s26 + $0x4] ss:$12 sps:$4 sm:$0xff]   ;;  %v4007_v3 = vld [vmem:[%s4904_s26] ss:$12 sps:$4 sm:$0xff]   ;;  %v4491_v4 = vmov 0   ;;  %v4492_v5 = vmov 0.0   ;;  %v809_v31 = vlaneseq }
 0x125   : > { %984 = vmatprep.mubr.bf16.mxu0 %v4491_v4  ;;  %3758 = vmatprep.subr.bf16.mxu1 %v4492_v5  ;;  %v4008_v6 = vld [vmem:[%s4904_s26 + $0x1c] ss:$12 sps:$4 sm:$0xff]   ;;  %vm4493_vm0 = vmmov 0   ;;  %v4010_v7 = vld [vmem:[%s4904_s26 + $0x18] ss:$12 sps:$4 sm:$0xff]   ;;  %v4984_v26 = vld [vmem:[#allocation13 + $0x8] sm:$0xff] }
 0x126   : > { %952 = vmatprep.subr.bf16.mxu0 %v4005_v2  ;;  %3774 = vmatprep.mubr.msk.bf16.mxu1 %vm4493_vm0, %v4492_v5  ;;  %v4011_v8 = vld [vmem:[%s4904_s26 + $0x34] ss:$12 sps:$4 sm:$0xff]   ;;  %v4013_v9 = vld [vmem:[%s4904_s26 + $0x30] ss:$12 sps:$4 sm:$0xff]   ;;  %v4014_v10 = vld [vmem:[%s4904_s26 + $0x4c] ss:$12 sps:$4 sm:$0xff]  }
 0x127   : > { %953 = vmatpush1.bf16.msra.mxu0 %v4007_v3  ;;  %v4016_v11 = vld [vmem:[%s4904_s26 + $0x48] ss:$12 sps:$4 sm:$0xff]   ;;  %v4017_v12 = vld [vmem:[%s4904_s26 + $0x64] ss:$12 sps:$4 sm:$0xff]   ;;  %v4030_v14 = vld [vmem:[%s4904_s26 + $0x20] ss:$12 sps:$4 sm:$0xff]  }
 0x128   : > { %954 = vmatprep.subr.bf16.mxu0 %v4008_v6  ;;  %v4029_v13 = vld [vmem:[%s4904_s26 + $0x8] ss:$12 sps:$4 sm:$0xff]   ;;  %v4019_v15 = vld [vmem:[%s4904_s26 + $0x60] ss:$12 sps:$4 sm:$0xff]   ;;  %v4031_v17 = vld [vmem:[%s4904_s26 + $0x38] ss:$12 sps:$4 sm:$0xff]  }
 0x129   : > { %3759 = vmatpush3.bf16.msra.mxu1 %v4029_v13  ;;  %v4020_v16 = vld [vmem:[%s4904_s26 + $0x7c] ss:$12 sps:$4 sm:$0xff]   ;;  %v4022_v18 = vld [vmem:[%s4904_s26 + $0x78] ss:$12 sps:$4 sm:$0xff]   ;;  %v4023_v19 = vld [vmem:[%s4904_s26 + $0x94] ss:$12 sps:$4 sm:$0xff]  }
 0x12a   : > { %3760 = vmatprep.subr.bf16.mxu1 %v4492_v5  ;;  %v4032_v20 = vld [vmem:[%s4904_s26 + $0x50] ss:$12 sps:$4 sm:$0xff]   ;;  %v4026_v22 = vld [vmem:[%s4904_s26 + $0xac] ss:$12 sps:$4 sm:$0xff]   ;;  %v4033_v23 = vld [vmem:[%s4904_s26 + $0x68] ss:$12 sps:$4 sm:$0xff]  }
 0x12b   : > { %955 = vmatpush1.bf16.msra.mxu0 %v4010_v7  ;;  %v4025_v21 = vld [vmem:[%s4904_s26 + $0x90] ss:$12 sps:$4 sm:$0xff]   ;;  %v4028_v24 = vld [vmem:[%s4904_s26 + $0xa8] ss:$12 sps:$4 sm:$0xff]   ;;  %v4034_v27 = vld [vmem:[%s4904_s26 + $0x80] ss:$12 sps:$4 sm:$0xff]  }
 0x12c   : > { %956 = vmatprep.subr.bf16.mxu0 %v4011_v8  ;;  %v4982_v25 = vld [vmem:[#allocation13] sm:$0xff]  ;;  %v4036_v30 = vld [vmem:[%s4904_s26 + $0xb0] ss:$12 sps:$4 sm:$0xff]   ;;  %v5001_v32 = vshrl.u32 %v809_v31, 7  ;;  %vm1036_vm1 = vcmask 261120   ;;  %vm1189_vm2 = vcmask 64512  }
 0x12d   : > { %3761 = vmatpush3.bf16.msra.mxu1 %v4030_v14  ;;  %v774_v28 = vpack.c.bf16 %v4984_v26, %v4982_v25  ;;  %v4035_v29 = vld [vmem:[%s4904_s26 + $0x98] ss:$12 sps:$4 sm:$0xff]   ;;  %v807_v34 = vld [vmem:[%s4929_s18] sm:$0x7]  ;;  %s4494_s1 = smov 96   ;;  %s4495_s4 = smov 64  }
 0x12e   : > { %3762 = vmatprep.subr.bf16.mxu1 %v4492_v5  ;;  %v815_v33 = vsub.s32 1, %v5001_v32  ;;  %v811_v35 = vsub.s32 0, %v5001_v32  ;;  %v819_v43 = vsub.s32 2, %v5001_v32  ;;  %v5041_v54 = vld [vmem:[#allocation5] sm:$0xff]  ;;  %s4496_s5 = smov 32   ;;  %vm2400_vm3 = vcmask 523264  }
 0x12f   : > { %957 = vmatpush1.bf16.msra.mxu0 %v4013_v9  ;;  %vm2403_vm4 = vcmask 785408   ;;  %s5439_s2 = sld [smem:[#allocation28_spill]]  ;;  %p3937_p6 = scmp.eq.s32.totalorder %s4594_s17, 2 }
 0x130   : > { %958 = vmatprep.subr.bf16.mxu0 %v4014_v10  ;;  %v816_v36 = vrot.slane %v807_v34, %v815_v33  ;;  %v812_v38 = vrot.slane %v807_v34, %v811_v35  ;;  %v820_v46 = vrot.slane %v807_v34, %v819_v43 }
 0x131   : > { %3763 = vmatpush3.bf16.msra.mxu1 %v4031_v17 }
 0x132   : > { %3764 = vmatprep.subr.bf16.mxu1 %v4492_v5 }
 0x133   : > { %959 = vmatpush1.bf16.msra.mxu0 %v4016_v11 }
 0x134   : > { %960 = vmatprep.subr.bf16.mxu0 %v4017_v12 }
 0x135   : > { %3765 = vmatpush3.bf16.msra.mxu1 %v4032_v20  ;;  %s5440_s27 = scalar_lea.vmem %s5439_s2, %s4914_s25 }
 0x136   : > { %3766 = vmatprep.subr.bf16.mxu1 %v4492_v5 }
 0x137   : > { %961 = vmatpush1.bf16.msra.mxu0 %v4019_v15 }
 0x138   : > { %962 = vmatprep.subr.bf16.mxu0 %v4020_v16 }
 0x139   : > { %3767 = vmatpush3.bf16.msra.mxu1 %v4033_v23 }
 0x13a   : > { %3768 = vmatprep.subr.bf16.mxu1 %v4492_v5 }
 0x13b   : > { %963 = vmatpush1.bf16.msra.mxu0 %v4022_v18 }
 0x13c   : > { %964 = vmatprep.subr.bf16.mxu0 %v4023_v19 }
 0x13d   : > { %3769 = vmatpush3.bf16.msra.mxu1 %v4034_v27 }
 0x13e   : > { %3770 = vmatprep.subr.bf16.mxu1 %v4492_v5 }
 0x13f   : > { %965 = vmatpush1.bf16.msra.mxu0 %v4025_v21 }
 0x140   : > { %966 = vmatprep.subr.bf16.mxu0 %v4026_v22 }
 0x141   : > { %3771 = vmatpush3.bf16.msra.mxu1 %v4035_v29 }
 0x142   : > { %3772 = vmatprep.subr.bf16.mxu1 %v4492_v5 }
 0x143   : > { %967 = vmatpush1.bf16.msra.mxu0 %v4028_v24 }
 0x144   : > { %3818 = vmatprep.subr.mxu0 %v4492_v5 }
 0x145   : > { %3773 = vmatpush3.bf16.msra.mxu1 %v4036_v30 }
 0x146   : > { %985 = vmatmul.mubr.bf16.vlgmr.msra.gmra.mrb[0].mxu0 %v774_v28  ;;  %3778 = vmatprep.subr.mxu1 %v4492_v5 }
 0x147   : > { %3820 = vmatprep.mubr.msk.f32.mxu0 %vm4493_vm0, %v4492_v5 }
 0x148   : > { %3775 = vmatmul.mubr.bf16.vlgmr.msra.gmra.mrb[0].mxu1 %v774_v28 }
 0x149   : > { %3780 = vmatprep.mubr.msk.f32.mxu1 %vm4493_vm0, %v4492_v5 }
 0x219   : > { %v986_v37 = vpop.f32.mrb[0].mxu0 }
 0x21a   : > { %v988_v39 = vpop.f32.mrb[1].mxu0  ;;  %v5015_v44 = vadd.f32 %v986_v37, %v812_v38 }
 0x21b   : > { %v5010_v40 = vadd.f32 %v988_v39, %v816_v36  ;;  %v990_v41 = vpop.f32.mrb[2].mxu0  ;;  %v1029_v48 = vpop.f32.mrb[0].mxu1 }
 0x21c   : > { %v992_v42 = vpop.f32.mrb[3].mxu0  ;;  %v5028_v47 = vadd.f32 %v990_v41, %v812_v38  ;;  %v5033_v49 = vadd.f32 %v1029_v48, %v820_v46  ;;  %v3776_v50 = vpop.f32.mrb[1].mxu1 }
 0x21d   : > { %3779 = vmatpush3.xpose.msk.msra.mxu1 %vm1036_vm1, %v5010_v40  ;;  %v5018_v45 = vadd.f32 %v992_v42, %v816_v36  ;;  %v1032_v51 = vpop.f32.mrb[2].mxu1 }
 0x21e   : > { %3783 = vmatprep.subr.mxu1 %v4492_v5  ;;  %v5037_v52 = vadd.f32 %v1032_v51, %v820_v46  ;;  %v3777_v53 = vpop.f32.mrb[3].mxu1 }
 0x220   : > { %3781 = vmatmul.mubr.msk.f32.vlgmr.msra.gmra.mrb[4].mxu1 %vm1036_vm1, %v5015_v44 }
 0x221   : > { %3784 = vmatpush3.xpose.msk.msra.mxu1 %vm1036_vm1, %v5018_v45  ;;  %3785 = vmatprep.mubr.msk.f32.mxu1 %vm4493_vm0, %v4492_v5 }
 0x222   : > { %3788 = vmatprep.subr.mxu1 %v4492_v5 }
 0x224   : > { %3786 = vmatmul.mubr.msk.f32.vlgmr.msra.gmra.mrb[6].mxu1 %vm1036_vm1, %v5028_v47 }
 0x225   : > { %3790 = vmatprep.mubr.msk.f32.mxu1 %vm4493_vm0, %v4492_v5  ;;  %3789 = vmatpush3.msra.mxu1 %v5033_v49 }
 0x226   : > { %3793 = vmatprep.subr.mxu1 %v4492_v5 }
 0x2f3   : > { %v1109_v55 = vpop.f32.mrb[4].mxu1 }
 0x2f4   : > { %v1110_v56 = vadd.f32 %v1109_v55, %v5041_v54  ;;  %v3782_v57 = vpop.f32.mrb[5].mxu1 }
 0x2f6   : > { %v1190_v58 = vsel %vm1189_vm2, %v1110_v56, -inf }
 0x2f7   : > { %1191 = vmax.xlane.f32.xlu0 %v1190_v58  ;;  %v1185_v59 = vpop.f32.mrb[6].mxu1 }
 0x2f8   : > { %v1186_v60 = vadd.f32 %v1185_v59, %v5041_v54  ;;  %v3787_v61 = vpop.f32.mrb[7].mxu1 }
 0x2fa   : > { %v1193_v62 = vsel %vm1189_vm2, %v1186_v60, -inf }
 0x2fb   : > { %1194 = vmax.xlane.f32.xlu0 %v1193_v62 }
 0x311   : > { %1366 = vrot.lane.b32.xlu0 %v5010_v40, %s4494_s1 }
 0x384   : > { %v1192_v63 = vpop.xlane.xlu0 %1191 }
 0x385   : > { %v1196_v0 = vsub.f32 %v1110_v56, %v1192_v63 }
 0x387   : > { %v1198_v1 = vmul.f32 1.442695, %v1196_v0 }
 0x388   : > { %v1195_v2 = vpop.xlane.xlu0 %1194 }
 0x389   : > { %4125 = vpow2.f32 %v1198_v1  ;;  %v1197_v3 = vsub.f32 %v1186_v60, %v1195_v2 }
 0x38b   : > { %v1200_v6 = vmul.f32 1.442695, %v1197_v3 }
 0x38c   : > { %v1367_v24 = vpop.permute.xlu0 %1366 }
 0x38d   : > { %4127 = vpow2.f32 %v1200_v6 }
 0x393   : > { %v4126_v7 = vpop.eup %4125 }
 0x394   : > { %v1202_v8 = vsel %vm1189_vm2, %v4126_v7, 0.0 }
 0x395   : > { %1203 = vadd.xlane.f32.xlu1 %v1202_v8 }
 0x397   : > { %v4128_v9 = vpop.eup %4127 }
 0x398   : > { %v1205_v10 = vsel %vm1189_vm2, %v4128_v9, 0.0 }
 0x399   : > { %1206 = vadd.xlane.f32.xlu1 %v1205_v10 }
 0x3aa   : > { %1364 = vrot.lane.b32.xlu1 %v5015_v44, %s4494_s1 }
 0x3ae   : > { %1444 = vrot.lane.b32.xlu1 %v5018_v45, %s4494_s1 }
 0x3b2   : > { %1442 = vrot.lane.b32.xlu1 %v5028_v47, %s4494_s1 }
 0x422   : > { %v1204_v11 = vpop.xlane.xlu1 %1203 }
 0x423   : > { %4129 = vrcp.f32 %v1204_v11 }
 0x426   : > { %v1207_v12 = vpop.xlane.xlu1 %1206 }
 0x427   : > { %4131 = vrcp.f32 %v1207_v12 }
 0x42a   : > { %v1365_v23 = vpop.permute.xlu1 %1364 }
 0x42d   : > { %v4130_v13 = vpop.eup %4129 }
 0x42e   : > { %v1210_v14 = vmul.f32 %v4130_v13, %v1204_v11  ;;  %v1445_v27 = vpop.permute.xlu1 %1444 }
 0x430   : > { %v1212_v15 = vsub.f32 2.0, %v1210_v14 }
 0x431   : > { %v4132_v16 = vpop.eup %4131 }
 0x432   : > { %v1214_v17 = vmul.f32 %v4130_v13, %v1212_v15  ;;  %v1211_v18 = vmul.f32 %v4132_v16, %v1207_v12  ;;  %v1443_v28 = vpop.permute.xlu1 %1442 }
 0x434   : > { %v1216_v19 = vmul.f32 %v4126_v7, %v1214_v17  ;;  %v1213_v20 = vsub.f32 2.0, %v1211_v18 }
 0x436   : > { %v1215_v21 = vmul.f32 %v4132_v16, %v1213_v20  ;;  %3791 = vmatmul.mubr.msk.f32.vlgmr.msra.gmra.mrb[8].mxu1 %vm1189_vm2, %v1216_v19 }
 0x437   : > { %3794 = vmatpush3.msra.mxu1 %v5037_v52  ;;  %3795 = vmatprep.mubr.msk.f32.mxu1 %vm4493_vm0, %v4492_v5 }
 0x438   : > { %v1217_v22 = vmul.f32 %v4128_v9, %v1215_v21  ;;  %3798 = vmatprep.subr.mxu1 %v4492_v5 }
 0x43a   : > { %3796 = vmatmul.mubr.msk.f32.vlgmr.msra.gmra.mrb[10].mxu1 %vm1189_vm2, %v1217_v22 }
 0x43b   : > { %3800 = vmatprep.mubr.msk.f32.mxu1 %vm4493_vm0, %v4492_v5 }
 0x43e   : > { %3799 = vmatpush3.xpose.msk.msra.mxu1 %vm1036_vm1, %v1367_v24 }
 0x43f   : > { %3803 = vmatprep.subr.mxu1 %v4492_v5 }
 0x441   : > { %3801 = vmatmul.mubr.msk.f32.vlgmr.msra.gmra.mrb[12].mxu1 %vm1036_vm1, %v1365_v23 }
 0x442   : > { %3804 = vmatpush3.xpose.msk.msra.mxu1 %vm1036_vm1, %v1445_v27  ;;  %3805 = vmatprep.mubr.msk.f32.mxu1 %vm4493_vm0, %v4492_v5 }
 0x443   : > { %3808 = vmatprep.subr.mxu1 %v4492_v5 }
 0x445   : > { %3806 = vmatmul.mubr.msk.f32.vlgmr.msra.gmra.mrb[14].mxu1 %vm1036_vm1, %v1443_v28 }
 0x446   : > { %3810 = vmatprep.mubr.msk.f32.mxu1 %vm4493_vm0, %v4492_v5 }
 0x509   : > { %v5075_v29 = vpop.f32.mrb[8].mxu1 }
 0x50a   : > { %v3792_v30 = vpop.f32.mrb[9].mxu1 }
 0x50d   : > { %v5077_v31 = vpop.f32.mrb[10].mxu1 }
 0x50e   : > { %v3797_v34 = vpop.f32.mrb[11].mxu1 }
 0x514   : > { %v1438_v36 = vpop.f32.mrb[12].mxu1 }
 0x515   : > { %v1439_v37 = vadd.f32 %v1438_v36, %v5041_v54  ;;  %v3802_v38 = vpop.f32.mrb[13].mxu1 }
 0x517   : > { %v1520_v39 = vsel %vm1189_vm2, %v1439_v37, -inf }
 0x518   : > { %1521 = vmax.xlane.f32.xlu0 %v1520_v39  ;;  %v1516_v41 = vpop.f32.mrb[14].mxu1 }
 0x519   : > { %v1517_v42 = vadd.f32 %v1516_v41, %v5041_v54  ;;  %v3807_v46 = vpop.f32.mrb[15].mxu1 }
 0x51b   : > { %v1523_v48 = vsel %vm1189_vm2, %v1517_v42, -inf }
 0x51c   : > { %1524 = vmax.xlane.f32.xlu1 %v1523_v48 }
 0x52d   : > { %1626 = vrot.lane.b32.xlu1 %v5037_v52, %s4494_s1 }
 0x531   : > { %1704 = vrot.lane.b32.xlu1 %v5010_v40, %s4495_s4 }
 0x535   : > { %1782 = vrot.lane.b32.xlu1 %v5018_v45, %s4495_s4 }
 0x539   : > { %1780 = vrot.lane.b32.xlu1 %v5028_v47, %s4495_s4 }
 0x5a5   : > { %v1522_v50 = vpop.xlane.xlu0 %1521 }
 0x5a6   : > { %v1526_v51 = vsub.f32 %v1439_v37, %v1522_v50 }
 0x5a8   : > { %v1528_v53 = vmul.f32 1.442695, %v1526_v51 }
 0x5a9   : > { %v1525_v55 = vpop.xlane.xlu1 %1524 }
 0x5aa   : > { %4133 = vpow2.f32 %v1528_v53  ;;  %v1527_v56 = vsub.f32 %v1517_v42, %v1525_v55 }
 0x5ac   : > { %v1530_v57 = vmul.f32 1.442695, %v1527_v56 }
 0x5ad   : > { %v1627_v58 = vpop.permute.xlu1 %1626 }
 0x5ae   : > { %4135 = vpow2.f32 %v1530_v57 }
 0x5b1   : > { %v1705_v59 = vpop.permute.xlu1 %1704 }
 0x5b2   : > { %3819 = vmatpush3.xpose.msk.msra.mxu0 %vm1036_vm1, %v1705_v59 }
 0x5b3   : > { %3828 = vmatprep.subr.mxu0 %v4492_v5 }
 0x5b4   : > { %v4134_v60 = vpop.eup %4133 }
 0x5b5   : > { %v1532_v61 = vsel %vm1189_vm2, %v4134_v60, 0.0  ;;  %v1783_v16 = vpop.permute.xlu1 %1782 }
 0x5b6   : > { %1533 = vadd.xlane.f32.xlu0 %v1532_v61 }
 0x5b8   : > { %v4136_v62 = vpop.eup %4135 }
 0x5b9   : > { %v1535_v63 = vsel %vm1189_vm2, %v4136_v62, 0.0  ;;  %v1781_v17 = vpop.permute.xlu1 %1780 }
 0x5ba   : > { %1536 = vadd.xlane.f32.xlu0 %v1535_v63 }
 0x5d0   : > { %1549 = vrot.lane.b32.xlu0 %v5033_v49, %s4494_s1 }
 0x5d4   : > { %1702 = vrot.lane.b32.xlu0 %v5015_v44, %s4495_s4 }
 0x643   : > { %v1534_v0 = vpop.xlane.xlu0 %1533 }
 0x644   : > { %4137 = vrcp.f32 %v1534_v0 }
 0x647   : > { %v1537_v1 = vpop.xlane.xlu0 %1536 }
 0x648   : > { %4139 = vrcp.f32 %v1537_v1 }
 0x64b   : > { %v1550_v2 = vpop.permute.xlu0 %1549 }
 0x64c   : > { %3809 = vmatpush3.msra.mxu1 %v1550_v2 }
 0x64d   : > { %3813 = vmatprep.subr.mxu1 %v4492_v5 }
 0x64e   : > { %v4138_v3 = vpop.eup %4137 }
 0x64f   : > { %v1540_v6 = vmul.f32 %v4138_v3, %v1534_v0  ;;  %v1703_v7 = vpop.permute.xlu0 %1702 }
 0x650   : > { %3821 = vmatmul.mubr.msk.f32.vlgmr.msra.gmra.mrb[4].mxu0 %vm1036_vm1, %v1703_v7 }
 0x651   : > { %v1542_v8 = vsub.f32 2.0, %v1540_v6  ;;  %3830 = vmatprep.mubr.msk.f32.mxu0 %vm4493_vm0, %v4492_v5 }
 0x652   : > { %v4140_v9 = vpop.eup %4139 }
 0x653   : > { %v1544_v10 = vmul.f32 %v4138_v3, %v1542_v8  ;;  %v1541_v11 = vmul.f32 %v4140_v9, %v1537_v1 }
 0x655   : > { %v1546_v12 = vmul.f32 %v4134_v60, %v1544_v10  ;;  %v1543_v13 = vsub.f32 2.0, %v1541_v11 }
 0x657   : > { %v1545_v14 = vmul.f32 %v4140_v9, %v1543_v13  ;;  %3811 = vmatmul.mubr.msk.f32.vlgmr.msra.gmra.mrb[16].mxu1 %vm1189_vm2, %v1546_v12 }
 0x658   : > { %3814 = vmatpush3.msra.mxu1 %v1627_v58  ;;  %3815 = vmatprep.mubr.msk.f32.mxu1 %vm4493_vm0, %v4492_v5 }
 0x659   : > { %v1547_v15 = vmul.f32 %v4136_v62, %v1545_v14  ;;  %3823 = vmatprep.subr.mxu1 %v4492_v5 }
 0x65b   : > { %3816 = vmatmul.mubr.msk.f32.vlgmr.msra.gmra.mrb[18].mxu1 %vm1189_vm2, %v1547_v15 }
 0x65c   : > { %3825 = vmatprep.mubr.msk.f32.mxu1 %vm4493_vm0, %v4492_v5 }
 0x65f   : > { %3824 = vmatpush3.xpose.msk.msra.mxu1 %vm1036_vm1, %v1783_v16 }
 0x660   : > { %3833 = vmatprep.subr.mxu1 %v4492_v5 }
 0x662   : > { %3826 = vmatmul.mubr.msk.f32.vlgmr.msra.gmra.mrb[20].mxu1 %vm1036_vm1, %v1781_v17 }
 0x663   : > { %3835 = vmatprep.mubr.msk.f32.mxu1 %vm4493_vm0, %v4492_v5 }
 0x723   : > { %v1776_v18 = vpop.f32.mrb[4].mxu0 }
 0x724   : > { %v1777_v19 = vadd.f32 %v1776_v18, %v5041_v54  ;;  %v3822_v20 = vpop.f32.mrb[5].mxu0 }
 0x726   : > { %v1858_v21 = vsel %vm1189_vm2, %v1777_v19, -inf }
 0x727   : > { %1859 = vmax.xlane.f32.xlu0 %v1858_v21 }
 0x72a   : > { %v5117_v22 = vpop.f32.mrb[16].mxu1 }
 0x72b   : > { %v3812_v23 = vpop.f32.mrb[17].mxu1 }
 0x72e   : > { %v5119_v24 = vpop.f32.mrb[18].mxu1 }
 0x72f   : > { %v3990_v27 = vpack.i.bf16 %v5119_v24, %v5117_v22  ;;  %v3817_v28 = vpop.f32.mrb[19].mxu1 }
 0x735   : > { %v1854_v30 = vpop.f32.mrb[20].mxu1 }
 0x736   : > { %v1855_v34 = vadd.f32 %v1854_v30, %v5041_v54  ;;  %v3827_v36 = vpop.f32.mrb[21].mxu1 }
 0x738   : > { %v1861_v37 = vsel %vm1189_vm2, %v1855_v34, -inf }
 0x739   : > { %1862 = vmax.xlane.f32.xlu1 %v1861_v37 }
 0x74a   : > { %1962 = vrot.lane.b32.xlu1 %v5037_v52, %s4495_s4 }
 0x74e   : > { %2040 = vrot.lane.b32.xlu1 %v5010_v40, %s4496_s5 }
 0x752   : > { %2118 = vrot.lane.b32.xlu1 %v5018_v45, %s4496_s5 }
 0x756   : > { %2116 = vrot.lane.b32.xlu1 %v5028_v47, %s4496_s5 }
 0x7b4   : > { %v1860_v38 = vpop.xlane.xlu0 %1859 }
 0x7b5   : > { %v1864_v39 = vsub.f32 %v1777_v19, %v1860_v38 }
 0x7b7   : > { %v1866_v41 = vmul.f32 1.442695, %v1864_v39 }
 0x7b9   : > { %4141 = vpow2.f32 %v1866_v41 }
 0x7c3   : > { %v4142_v42 = vpop.eup %4141 }
 0x7c4   : > { %v1870_v46 = vsel %vm1189_vm2, %v4142_v42, 0.0 }
 0x7c5   : > { %1871 = vadd.xlane.f32.xlu0 %v1870_v46 }
 0x7c6   : > { %v1863_v48 = vpop.xlane.xlu1 %1862 }
 0x7c7   : > { %v1865_v50 = vsub.f32 %v1855_v34, %v1863_v48 }
 0x7c9   : > { %v1868_v51 = vmul.f32 1.442695, %v1865_v50 }
 0x7ca   : > { %v1963_v53 = vpop.permute.xlu1 %1962 }
 0x7cb   : > { %4143 = vpow2.f32 %v1868_v51  ;;  %3834 = vmatpush3.msra.mxu1 %v1963_v53 }
 0x7cc   : > { %3843 = vmatprep.subr.mxu1 %v4492_v5 }
 0x7d5   : > { %v4144_v40 = vpop.eup %4143 }
 0x7d6   : > { %v1873_v45 = vsel %vm1189_vm2, %v4144_v40, 0.0 }
 0x7d7   : > { %1874 = vadd.xlane.f32.xlu0 %v1873_v45 }
 0x7ed   : > { %1886 = vrot.lane.b32.xlu0 %v5033_v49, %s4495_s4 }
 0x7f1   : > { %2038 = vrot.lane.b32.xlu0 %v5015_v44, %s4496_s5  ;;  %v2041_v44 = vpop.permute.xlu1 %2040 }
 0x7f5   : > { %v2119_v3 = vpop.permute.xlu1 %2118 }
 0x7f9   : > { %v2117_v7 = vpop.permute.xlu1 %2116 }
 0x852   : > { %v1872_v47 = vpop.xlane.xlu0 %1871 }
 0x853   : > { %4145 = vrcp.f32 %v1872_v47 }
 0x85d   : > { %v4146_v55 = vpop.eup %4145 }
 0x85e   : > { %v1878_v56 = vmul.f32 %v4146_v55, %v1872_v47  ;;  %v4037_v47 = vld [vmem:[%s4944_s15] sm:$0xff]  }
 0x860   : > { %v1880_v57 = vsub.f32 2.0, %v1878_v56  ;;  %v4039_v56 = vld [vmem:[%s4944_s15 + $0x10] sm:$0xff]  }
 0x862   : > { %v1882_v58 = vmul.f32 %v4146_v55, %v1880_v57  ;;  %v4038_v55 = vld [vmem:[%s4944_s15 + $0x8] sm:$0xff]   ;;  %v4040_v57 = vld [vmem:[%s4944_s15 + $0x18] sm:$0xff]  }
 0x864   : > { %v1875_v59 = vpop.xlane.xlu0 %1874  ;;  %v1884_v60 = vmul.f32 %v4142_v42, %v1882_v58  ;;  %v4041_v58 = vld [vmem:[%s4944_s15 + $0x20] sm:$0xff]  }
 0x865   : > { %4147 = vrcp.f32 %v1875_v59 }
 0x868   : > { %v1887_v61 = vpop.permute.xlu0 %1886 }
 0x869   : > { %3829 = vmatpush3.msra.mxu0 %v1887_v61 }
 0x86a   : > { %3831 = vmatmul.mubr.msk.f32.vlgmr.msra.gmra.mrb[6].mxu0 %vm1189_vm2, %v1884_v60  ;;  %3838 = vmatprep.subr.mxu0 %v4492_v5  ;;  %v4043_v60 = vld [vmem:[%s4944_s15 + $0x30] sm:$0xff]  }
 0x86b   : > { %3840 = vmatprep.mubr.msk.f32.mxu0 %vm4493_vm0, %v4492_v5 }
 0x86c   : > { %v2039_v1 = vpop.permute.xlu0 %2038 }
 0x86f   : > { %v4148_v62 = vpop.eup %4147 }
 0x870   : > { %v1879_v63 = vmul.f32 %v4148_v62, %v1875_v59  ;;  %3839 = vmatpush3.xpose.msk.msra.mxu0 %vm1036_vm1, %v2041_v44  ;;  %v4042_v59 = vld [vmem:[%s4944_s15 + $0x28] sm:$0xff]  }
 0x871   : > { %3848 = vmatprep.subr.mxu0 %v4492_v5 }
 0x872   : > { %v1881_v0 = vsub.f32 2.0, %v1879_v63 }
 0x873   : > { %3841 = vmatmul.mubr.msk.f32.vlgmr.msra.gmra.mrb[8].mxu0 %vm1036_vm1, %v2039_v1 }
 0x874   : > { %v1883_v2 = vmul.f32 %v4148_v62, %v1881_v0  ;;  %3850 = vmatprep.mubr.msk.f32.mxu0 %vm4493_vm0, %v4492_v5  ;;  %v4044_v62 = vld [vmem:[%s4944_s15 + $0x38] sm:$0xff]  }
 0x876   : > { %v1885_v6 = vmul.f32 %v4144_v40, %v1883_v2 }
 0x878   : > { %3836 = vmatmul.mubr.msk.f32.vlgmr.msra.gmra.mrb[22].mxu1 %vm1189_vm2, %v1885_v6 }
 0x879   : > { %3844 = vmatpush3.xpose.msk.msra.mxu1 %vm1036_vm1, %v2119_v3  ;;  %3845 = vmatprep.mubr.msk.f32.mxu1 %vm4493_vm0, %v4492_v5 }
 0x87a   : > { %3853 = vmatprep.subr.mxu1 %v4492_v5 }
 0x87c   : > { %3846 = vmatmul.mubr.msk.f32.vlgmr.msra.gmra.mrb[24].mxu1 %vm1036_vm1, %v2117_v7 }
 0x87d   : > { %3855 = vmatprep.mubr.msk.f32.mxu1 %vm4493_vm0, %v4492_v5 }
 0x93d   : > { %v1958_v8 = vpop.f32.mrb[6].mxu0 }
 0x93e   : > { %v3832_v9 = vpop.f32.mrb[7].mxu0 }
 0x946   : > { %v2112_v10 = vpop.f32.mrb[8].mxu0 }
 0x947   : > { %v2113_v11 = vadd.f32 %v2112_v10, %v5041_v54  ;;  %v3842_v12 = vpop.f32.mrb[9].mxu0 }
 0x949   : > { %v2194_v13 = vsel %vm1189_vm2, %v2113_v11, -inf }
 0x94a   : > { %2195 = vmax.xlane.f32.xlu0 %v2194_v13 }
 0x94b   : > { %v2034_v14 = vpop.f32.mrb[22].mxu1 }
 0x94c   : > { %v3995_v15 = vpack.i.bf16 %v2034_v14, %v1958_v8  ;;  %v3837_v16 = vpop.f32.mrb[23].mxu1 }
 0x94f   : > { %v2190_v17 = vpop.f32.mrb[24].mxu1 }
 0x950   : > { %v2191_v18 = vadd.f32 %v2190_v17, %v5041_v54  ;;  %v3847_v19 = vpop.f32.mrb[25].mxu1 }
 0x951   : > { %v3579_v19 = vld [vmem:[%s633_s3] ss:$0 sm:$0xff] }
 0x952   : > { %v2197_v20 = vsel %vm1189_vm2, %v2191_v18, -inf }
 0x953   : > { %2198 = vmax.xlane.f32.xlu1 %v2197_v20 }
 0x964   : > { %2298 = vrot.lane.b32.xlu1 %v5037_v52, %s4496_s5 }
 0x968   : > { %3991 = vrot.lane.b32.xlu1 %v3990_v27, %s4496_s5 }
 0x96c   : > { %3996 = vrot.lane.b32.xlu1 %v3995_v15, %s4495_s4 }
 0x9d7   : > { %v2196_v21 = vpop.xlane.xlu0 %2195 }
 0x9d8   : > { %v2200_v23 = vsub.f32 %v2113_v11, %v2196_v21 }
 0x9da   : > { %v2202_v28 = vmul.f32 1.442695, %v2200_v23 }
 0x9dc   : > { %4149 = vpow2.f32 %v2202_v28 }
 0x9e0   : > { %v2199_v30 = vpop.xlane.xlu1 %2198 }
 0x9e1   : > { %v2201_v54 = vsub.f32 %v2191_v18, %v2199_v30 }
 0x9e3   : > { %v2204_v34 = vmul.f32 1.442695, %v2201_v54 }
 0x9e4   : > { %v2299_v36 = vpop.permute.xlu1 %2298 }
 0x9e5   : > { %4151 = vpow2.f32 %v2204_v34  ;;  %3854 = vmatpush3.msra.mxu1 %v2299_v36 }
 0x9e6   : > { %v4150_v37 = vpop.eup %4149 }
 0x9e7   : > { %v2206_v52 = vsel %vm1189_vm2, %v4150_v37, 0.0 }
 0x9e8   : > { %2207 = vadd.xlane.f32.xlu0 %v2206_v52  ;;  %v3992_v2 = vpop.permute.xlu1 %3991  ;;  %v4050_v52 = vld [vmem:[%s4948_s13 + $0xc] ss:$16 sps:$4 sm:$0xff]  }
 0x9e9   : > { %v3994_v6 = vunpack.i.h.bf16 %v3992_v2  ;;  %v3993_v7 = vunpack.i.l.bf16 %v3992_v2  ;;  %v4090_v2 = vld [vmem:[%s4948_s13 + $0xe8] ss:$16 sps:$4 sm:$0xff]  }
 0x9eb   : > { %v2398_v11 = vsel %vm1036_vm1, %v5075_v29, %v3993_v7 }
 0x9ec   : > { %v3997_v3 = vpop.permute.xlu1 %3996 }
 0x9ed   : > { %v3999_v8 = vunpack.i.h.bf16 %v3997_v3  ;;  %v3998_v9 = vunpack.i.l.bf16 %v3997_v3  ;;  %v4093_v3 = vld [vmem:[%s4950_s12 + $0x40] sm:$0xff]  }
 0x9ef   : > { %v4152_v38 = vpop.eup %4151  ;;  %v2401_v14 = vsel %vm2400_vm3, %v2398_v11, %v3998_v9 }
 0x9f0   : > { %v2209_v22 = vsel %vm1189_vm2, %v4152_v38, 0.0 }
 0x9f1   : > { %2210 = vadd.xlane.f32.xlu0 %v2209_v22  ;;  %v4053_v22 = vld [vmem:[%s4948_s13 + $0x24] ss:$16 sps:$4 sm:$0xff]  }
 0xa07   : > { %2222 = vrot.lane.b32.xlu0 %v5033_v49, %s4496_s5 }
 0xa75   : > { %v2208_v24 = vpop.xlane.xlu0 %2207 }
 0xa76   : > { %4153 = vrcp.f32 %v2208_v24 }
 0xa7e   : > { %v2211_v27 = vpop.xlane.xlu0 %2210 }
 0xa7f   : > { %4155 = vrcp.f32 %v2211_v27 }
 0xa80   : > { %v4154_v39 = vpop.eup %4153 }
 0xa81   : > { %v2214_v41 = vmul.f32 %v4154_v39, %v2208_v24  ;;  %v4056_v24 = vld [vmem:[%s4948_s13 + $0x2c] ss:$16 sps:$4 sm:$0xff]  }
 0xa82   : > { %v2223_v42 = vpop.permute.xlu0 %2222 }
 0xa83   : > { %v2216_v46 = vsub.f32 2.0, %v2214_v41  ;;  %3849 = vmatpush3.msra.mxu0 %v2223_v42  ;;  %v4059_v41 = vld [vmem:[%s4948_s13 + $0x44] ss:$16 sps:$4 sm:$0xff]   ;;  %v4062_v42 = vld [vmem:[%s4948_s13 + $0x4c] ss:$16 sps:$4 sm:$0xff]  }
 0xa84   : > { %3858 = vmatprep.subr.bf16.mxu0 %v4492_v5 }
 0xa85   : > { %v2218_v48 = vmul.f32 %v4154_v39, %v2216_v46  ;;  %v4054_v39 = vld [vmem:[%s4948_s13 + $0x28] ss:$16 sps:$4 sm:$0xff]   ;;  %v4057_v46 = vld [vmem:[%s4948_s13 + $0x40] ss:$16 sps:$4 sm:$0xff]  }
 0xa87   : > { %v2220_v50 = vmul.f32 %v4150_v37, %v2218_v48  ;;  %v4047_v37 = vld [vmem:[%s4948_s13 + $0x4] ss:$16 sps:$4 sm:$0xff]   ;;  %v4060_v48 = vld [vmem:[%s4948_s13 + $0x48] ss:$16 sps:$4 sm:$0xff]  }
 0xa88   : > { %2783 = vmatprep.subr.bf16.mxu1 %v4047_v37 }
 0xa89   : > { %v4156_v51 = vpop.eup %4155  ;;  %3851 = vmatmul.mubr.msk.f32.vlgmr.msra.gmra.mrb[10].mxu0 %vm1189_vm2, %v2220_v50  ;;  %v4065_v50 = vld [vmem:[%s4948_s13 + $0x64] ss:$16 sps:$4 sm:$0xff]  }
 0xa8a   : > { %v2215_v49 = vmul.f32 %v4156_v51, %v2211_v27  ;;  %3874 = vmatprep.mubr.msk.bf16.mxu0 %vm4493_vm0, %v4492_v5  ;;  %3859 = vmatpush3.bf16.msra.mxu0 %v4037_v47  ;;  %v4051_v27 = vld [vmem:[%s4948_s13 + $0x20] ss:$16 sps:$4 sm:$0xff]   ;;  %v4072_v47 = vld [vmem:[%s4948_s13 + $0x88] ss:$16 sps:$4 sm:$0xff]  }
 0xa8b   : > { %3860 = vmatprep.subr.bf16.mxu0 %v4492_v5 }
 0xa8c   : > { %v2217_v53 = vsub.f32 2.0, %v2215_v49  ;;  %v4063_v49 = vld [vmem:[%s4948_s13 + $0x60] ss:$16 sps:$4 sm:$0xff]  }
 0xa8e   : > { %v2219_v40 = vmul.f32 %v4156_v51, %v2217_v53  ;;  %3861 = vmatpush3.bf16.msra.mxu0 %v4038_v55  ;;  %v4068_v51 = vld [vmem:[%s4948_s13 + $0x6c] ss:$16 sps:$4 sm:$0xff]   ;;  %v4066_v53 = vld [vmem:[%s4948_s13 + $0x68] ss:$16 sps:$4 sm:$0xff]  }
 0xa8f   : > { %3862 = vmatprep.subr.bf16.mxu0 %v4492_v5  ;;  %v4074_v55 = vld [vmem:[%s4948_s13 + $0x8c] ss:$16 sps:$4 sm:$0xff]  }
 0xa90   : > { %v2221_v45 = vmul.f32 %v4152_v38, %v2219_v40  ;;  %v4048_v38 = vld [vmem:[%s4948_s13 + $0x8] ss:$16 sps:$4 sm:$0xff]   ;;  %v4071_v40 = vld [vmem:[%s4948_s13 + $0x84] ss:$16 sps:$4 sm:$0xff]  }
 0xa92   : > { %3856 = vmatmul.mubr.msk.f32.vlgmr.msra.gmra.mrb[26].mxu1 %vm1189_vm2, %v2221_v45  ;;  %3863 = vmatpush3.bf16.msra.mxu0 %v4039_v56  ;;  %v4069_v45 = vld [vmem:[%s4948_s13 + $0x80] ss:$16 sps:$4 sm:$0xff]   ;;  %v4077_v56 = vld [vmem:[%s4948_s13 + $0xa4] ss:$16 sps:$4 sm:$0xff]  }
 0xa93   : > { %2815 = vmatprep.mubr.bf16.mxu1 %v4491_v4  ;;  %3864 = vmatprep.subr.bf16.mxu0 %v4492_v5 }
 0xa96   : > { %3865 = vmatpush3.bf16.msra.mxu0 %v4040_v57  ;;  %v4080_v57 = vld [vmem:[%s4948_s13 + $0xac] ss:$16 sps:$4 sm:$0xff]  }
 0xa97   : > { %3866 = vmatprep.subr.bf16.mxu0 %v4492_v5 }
 0xa9a   : > { %3867 = vmatpush3.bf16.msra.mxu0 %v4041_v58  ;;  %v4075_v58 = vld [vmem:[%s4948_s13 + $0xa0] ss:$16 sps:$4 sm:$0xff]  }
 0xa9b   : > { %3868 = vmatprep.subr.bf16.mxu0 %v4492_v5 }
 0xa9e   : > { %3869 = vmatpush3.bf16.msra.mxu0 %v4042_v59  ;;  %v4078_v59 = vld [vmem:[%s4948_s13 + $0xa8] ss:$16 sps:$4 sm:$0xff]  }
 0xa9f   : > { %3870 = vmatprep.subr.bf16.mxu0 %v4492_v5 }
 0xaa2   : > { %3871 = vmatpush3.bf16.msra.mxu0 %v4043_v60  ;;  %v4083_v60 = vld [vmem:[%s4948_s13 + $0xc4] ss:$16 sps:$4 sm:$0xff]  }
 0xaa3   : > { %3872 = vmatprep.subr.bf16.mxu0 %v4492_v5  ;;  %v2399_v5 = vsel %vm1036_vm1, %v5077_v31, %v3994_v6  ;;  %v4094_v6 = vld [vmem:[%s4950_s12 + $0xc0] sm:$0xff]  }
 0xaa4   : > { %v2402_v15 = vsel %vm2400_vm3, %v2399_v5, %v3999_v8 }
 0xaa6   : > { %3873 = vmatpush3.bf16.msra.mxu0 %v4044_v62  ;;  %v4081_v62 = vld [vmem:[%s4948_s13 + $0xc0] ss:$16 sps:$4 sm:$0xff]  }
 0xaa7   : > { %2826 = vmatprep.subr.bf16.mxu0 %v4050_v52  ;;  %v4095_v52 = vld [vmem:[%s4950_s12] sm:$0xff]  }
 0xb5c   : > { %v2294_v61 = vpop.f32.mrb[10].mxu0 }
 0xb5d   : > { %v3852_v44 = vpop.f32.mrb[11].mxu0 }
 0xb5e   : > { %v4084_v44 = vld [vmem:[%s4948_s13 + $0xc8] ss:$16 sps:$4 sm:$0xff]  }
 0xb65   : > { %v2370_v63 = vpop.f32.mrb[26].mxu1 }
 0xb66   : > { %v4000_v0 = vpack.i.bf16 %v2370_v63, %v2294_v61  ;;  %v3857_v1 = vpop.f32.mrb[27].mxu1  ;;  %v4086_v61 = vld [vmem:[%s4948_s13 + $0xcc] ss:$16 sps:$4 sm:$0xff]   ;;  %v4089_v63 = vld [vmem:[%s4948_s13 + $0xe4] ss:$16 sps:$4 sm:$0xff]  }
 0xb67   : > { %v4087_v1 = vld [vmem:[%s4948_s13 + $0xe0] ss:$16 sps:$4 sm:$0xff]  }
 0xb68   : > { %4001 = vrot.lane.b32.xlu0 %v4000_v0, %s4494_s1  ;;  %v4092_v0 = vld [vmem:[%s4948_s13 + $0xec] ss:$16 sps:$4 sm:$0xff]  }
 0xbda   : > { %v4002_v10 = vpop.permute.xlu0 %4001 }
 0xbdb   : > { %v4004_v12 = vunpack.i.h.bf16 %v4002_v10  ;;  %v4003_v13 = vunpack.i.l.bf16 %v4002_v10 }
 0xbdd   : > { %v2405_v16 = vsel %vm2403_vm4, %v2402_v15, %v4004_v12  ;;  %v2404_v17 = vsel %vm2403_vm4, %v2401_v14, %v4003_v13 }
 0xbde   : > { %v2406_v18 = vpack.c.bf16 %v2405_v16, %v2404_v17 }
 0xbe0   : > { %3875 = vmatmul.mubr.bf16.vlgmr.msra.gmra.mrb[12].mxu0 %v2406_v18 }
 0xbe1   : > { %2858 = vmatprep.mubr.bf16.mxu0 %v4491_v4  ;;  %2827 = vmatpush1.bf16.msra.mxu0 %v4048_v38  ;;  %v4097_v38 = vld [vmem:[%s4950_s12 + $0x48] sm:$0xff]  }
 0xbe2   : > { %2828 = vmatprep.subr.bf16.mxu0 %v4056_v24  ;;  %v4099_v24 = vld [vmem:[%s4950_s12 + $0x8] sm:$0xff]  }
 0xbe5   : > { %2829 = vmatpush1.bf16.msra.mxu0 %v4054_v39  ;;  %v4101_v39 = vld [vmem:[%s4950_s12 + $0x50] sm:$0xff]  }
 0xbe6   : > { %2830 = vmatprep.subr.bf16.mxu0 %v4062_v42  ;;  %v4103_v42 = vld [vmem:[%s4950_s12 + $0x10] sm:$0xff]  }
 0xbe9   : > { %2831 = vmatpush1.bf16.msra.mxu0 %v4060_v48  ;;  %v4105_v48 = vld [vmem:[%s4950_s12 + $0x58] sm:$0xff]  }
 0xbea   : > { %2832 = vmatprep.subr.bf16.mxu0 %v4068_v51  ;;  %v4107_v51 = vld [vmem:[%s4950_s12 + $0x18] sm:$0xff]  }
 0xbed   : > { %2833 = vmatpush1.bf16.msra.mxu0 %v4066_v53  ;;  %v4109_v53 = vld [vmem:[%s4950_s12 + $0x60] sm:$0xff]  }
 0xbee   : > { %2834 = vmatprep.subr.bf16.mxu0 %v4074_v55  ;;  %v4113_v55 = vld [vmem:[%s4950_s12 + $0x68] sm:$0xff]  }
 0xbf1   : > { %2835 = vmatpush1.bf16.msra.mxu0 %v4072_v47  ;;  %v4112_v47 = vld [vmem:[%s4950_s12 + $0xa0] sm:$0xff]  }
 0xbf2   : > { %2836 = vmatprep.subr.bf16.mxu0 %v4080_v57  ;;  %v4115_v57 = vld [vmem:[%s4950_s12 + $0x28] sm:$0xff]  }
 0xbf5   : > { %2837 = vmatpush1.bf16.msra.mxu0 %v4078_v59  ;;  %v4117_v59 = vld [vmem:[%s4950_s12 + $0x70] sm:$0xff]  }
 0xbf6   : > { %2838 = vmatprep.subr.bf16.mxu0 %v4086_v61  ;;  %v4119_v61 = vld [vmem:[%s4950_s12 + $0x30] sm:$0xff]  }
 0xbf9   : > { %2839 = vmatpush1.bf16.msra.mxu0 %v4084_v44  ;;  %v4121_v44 = vld [vmem:[%s4950_s12 + $0x78] sm:$0xff]  }
 0xbfa   : > { %2840 = vmatprep.subr.bf16.mxu0 %v4092_v0  ;;  %v4123_v0 = vld [vmem:[%s4950_s12 + $0x38] sm:$0xff]  }
 0xbfd   : > { %2841 = vmatpush1.bf16.msra.mxu0 %v4090_v2  ;;  %v2601_v2 = vld [vmem:[%s4934_s14] sm:$0xf]  ;;  %s4497_s14 = smov [#allocation13]  }
 0xbfe   : > { %3736 = vmatprep.subr.bf16.mxu0 %v4094_v6  ;;  %v2606_v6 = vrot.slane %v2601_v2, %v811_v35  ;;  %s3280_s22 = sshll.u32 %s4497_s14, 4  ;;  %s3281_s22 = int_to_ptr.vmem [resolvable:$true] %s3280_s22 }
 0xbff   : > { %p4408_p5 = scmp.lt.s32.totalorder %s3281_s22, %s3281_s22 }
 0xcb3   : > { %v2512_v20 = vpop.f32.mrb[12].mxu0 }
 0xcb4   : > { %v2513_v21 = vadd.f32 %v3579_v19, %v2512_v20  ;;  %v3876_v31 = vpop.f32.mrb[13].mxu0 }
 0xcb5   : > { %v2515_v23 = vpop.f32.mrb[14].mxu0 }
 0xcb6   : > { %v2519_v29 = vmax.f32 %v2513_v21, 0.0  ;;  %v2516_v28 = vadd.f32 %v3579_v19, %v2515_v23  ;;  %v3877_v30 = vpop.f32.mrb[15].mxu0  ;;  %v3588_v23 = vld [vmem:[%s641_s9] ss:$0 sm:$0xff] }
 0xcb8   : > { %v5202_v54 = vadd.f32 %v2519_v29, %v4982_v25  ;;  %v2520_v34 = vmax.f32 %v2516_v28, 0.0 }
 0xcba   : > { %v5205_v4 = vadd.f32 %v2520_v34, %v4984_v26  ;;  %2525 = vadd.xlane.f32.xlu1 %v5202_v54  ;;  %v2532_v36 = vmul.f32 %v5202_v54, %v5202_v54  ;;  %v4045_v26 = vld [vmem:[%s4948_s13] ss:$16 sps:$4 sm:$0xff]  }
 0xcbb   : > { %2784 = vmatpush1.bf16.msra.mxu1 %v4045_v26  ;;  %v4096_v26 = vld [vmem:[%s4950_s12 + $0x80] sm:$0xff]  }
 0xcbc   : > { %2527 = vadd.xlane.f32.xlu0 %v5205_v4  ;;  %v2533_v25 = vmul.f32 %v5205_v4, %v5205_v4  ;;  %2785 = vmatprep.subr.bf16.mxu1 %v4053_v22  ;;  %v4098_v22 = vld [vmem:[%s4950_s12 + $0xc8] sm:$0xff]  }
 0xcbf   : > { %2786 = vmatpush1.bf16.msra.mxu1 %v4051_v27  ;;  %v4100_v27 = vld [vmem:[%s4950_s12 + $0x88] sm:$0xff]  }
 0xcc0   : > { %2534 = vadd.xlane.f32.xlu0 %v2532_v36  ;;  %2787 = vmatprep.subr.bf16.mxu1 %v4059_v41  ;;  %v3589_v36 = vld [vmem:[%s5440_s27] ss:$0 sm:$0xff]  ;;  %v4102_v41 = vld [vmem:[%s4950_s12 + $0xd0] sm:$0xff]  }
 0xcc3   : > { %2788 = vmatpush1.bf16.msra.mxu1 %v4057_v46  ;;  %v4104_v46 = vld [vmem:[%s4950_s12 + $0x90] sm:$0xff]  }
 0xcc4   : > { %2536 = vadd.xlane.f32.xlu0 %v2533_v25  ;;  %2789 = vmatprep.subr.bf16.mxu1 %v4065_v50  ;;  %v4106_v50 = vld [vmem:[%s4950_s12 + $0xd8] sm:$0xff]  }
 0xcc7   : > { %2790 = vmatpush1.bf16.msra.mxu1 %v4063_v49  ;;  %v4108_v49 = vld [vmem:[%s4950_s12 + $0x98] sm:$0xff]  }
 0xcc8   : > { %2791 = vmatprep.subr.bf16.mxu1 %v4071_v40  ;;  %v4110_v40 = vld [vmem:[%s4950_s12 + $0xe0] sm:$0xff]  }
 0xccb   : > { %2792 = vmatpush1.bf16.msra.mxu1 %v4069_v45  ;;  %v4111_v45 = vld [vmem:[%s4950_s12 + $0x20] sm:$0xff]  }
 0xccc   : > { %2793 = vmatprep.subr.bf16.mxu1 %v4077_v56  ;;  %v4114_v56 = vld [vmem:[%s4950_s12 + $0xe8] sm:$0xff]  }
 0xccf   : > { %2794 = vmatpush1.bf16.msra.mxu1 %v4075_v58  ;;  %v4116_v58 = vld [vmem:[%s4950_s12 + $0xa8] sm:$0xff]  }
 0xcd0   : > { %2795 = vmatprep.subr.bf16.mxu1 %v4083_v60  ;;  %v4118_v60 = vld [vmem:[%s4950_s12 + $0xf0] sm:$0xff]  }
 0xcd3   : > { %2796 = vmatpush1.bf16.msra.mxu1 %v4081_v62  ;;  %v4120_v62 = vld [vmem:[%s4950_s12 + $0xb0] sm:$0xff]  }
 0xcd4   : > { %2797 = vmatprep.subr.bf16.mxu1 %v4089_v63  ;;  %v4122_v63 = vld [vmem:[%s4950_s12 + $0xf8] sm:$0xff]  }
 0xcd7   : > { %2798 = vmatpush1.bf16.msra.mxu1 %v4087_v1  ;;  %v4124_v1 = vld [vmem:[%s4950_s12 + $0xb8] sm:$0xff]  }
 0xcd8   : > { %3714 = vmatprep.subr.bf16.mxu1 %v4093_v3  ;;  %v2617_v3 = vsub.s32 3, %v5001_v32 }
 0xd47   : > { %v2526_v7 = vpop.xlane.xlu1 %2525 }
 0xd48   : > { %v2530_v9 = vmul.f32 0.0078125, %v2526_v7  ;;  %v2614_v7 = vrot.slane %v2601_v2, %v819_v43 }
 0xd49   : > { %v2528_v8 = vpop.xlane.xlu0 %2527 }
 0xd4a   : > { %v2540_v5 = vmul.f32 %v2530_v9, %v2530_v9  ;;  %v2531_v11 = vmul.f32 0.0078125, %v2528_v8  ;;  %v2544_v20 = vsub.f32 %v5202_v54, %v2530_v9  ;;  %v2610_v8 = vrot.slane %v2601_v2, %v815_v33 }
 0xd4b   : > { %v2618_v9 = vrot.slane %v2601_v2, %v2617_v3 }
 0xd4c   : > { %v2541_v15 = vmul.f32 %v2531_v11, %v2531_v11  ;;  %v2545_v29 = vsub.f32 %v5205_v4, %v2531_v11 }
 0xd4d   : > { %v2535_v10 = vpop.xlane.xlu0 %2534 }
 0xd4e   : > { %v2538_v12 = vmul.f32 0.0078125, %v2535_v10 }
 0xd50   : > { %v2542_v13 = vsub.f32 %v2538_v12, %v2540_v5 }
 0xd51   : > { %v2537_v14 = vpop.xlane.xlu0 %2536 }
 0xd52   : > { %v2546_v16 = vadd.f32 1e-05, %v2542_v13  ;;  %v2539_v17 = vmul.f32 0.0078125, %v2537_v14 }
 0xd54   : > { %4157 = vrsqrt.f32 %v2546_v16  ;;  %v2543_v18 = vsub.f32 %v2539_v17, %v2541_v15 }
 0xd56   : > { %v2547_v19 = vadd.f32 1e-05, %v2543_v18 }
 0xd58   : > { %4159 = vrsqrt.f32 %v2547_v19 }
 0xd5e   : > { %v4158_v21 = vpop.eup %4157 }
 0xd5f   : > { %v2550_v31 = vmul.f32 %v4158_v21, %v2544_v20 }
 0xd61   : > { %v2558_v34 = vmul.f32 %v3588_v23, %v2550_v31 }
 0xd62   : > { %v4160_v28 = vpop.eup %4159 }
 0xd63   : > { %v2551_v30 = vmul.f32 %v4160_v28, %v2545_v29  ;;  %v5256_v54 = vadd.f32 %v3589_v36, %v2558_v34 }
 0xd65   : > { %v2559_v25 = vmul.f32 %v3588_v23, %v2551_v30 }
 0xd67   : > { %v5258_v37 = vadd.f32 %v3589_v36, %v2559_v25 }
 0xd69   : > { %v2568_v4 = vpack.c.bf16 %v5258_v37, %v5256_v54 }
 0xd6b   : > { %2816 = vmatmul.mubr.bf16.vlgmr.msra.gmra.mrb[28].mxu1 %v2568_v4  ;;  %2859 = vmatmul.mubr.bf16.vlgmr.msra.gmra.mrb[16].mxu0 %v2568_v4 }
 0xd6c   : > { %3715 = vmatpush3.bf16.msra.mxu1 %v4095_v52  ;;  %3737 = vmatpush3.bf16.msra.mxu0 %v4096_v26 }
 0xd6d   : > { %3716 = vmatprep.subr.bf16.mxu1 %v4097_v38  ;;  %3738 = vmatprep.subr.bf16.mxu0 %v4098_v22 }
 0xd70   : > { %3717 = vmatpush3.bf16.msra.mxu1 %v4099_v24  ;;  %3739 = vmatpush3.bf16.msra.mxu0 %v4100_v27  ;;  %v3622_v24 = vld [vmem:[%s755_s29] ss:$0 sm:$0xff] }
 0xd71   : > { %3718 = vmatprep.subr.bf16.mxu1 %v4101_v39  ;;  %3740 = vmatprep.subr.bf16.mxu0 %v4102_v41 }
 0xd74   : > { %3719 = vmatpush3.bf16.msra.mxu1 %v4103_v42  ;;  %3741 = vmatpush3.bf16.msra.mxu0 %v4104_v46 }
 0xd75   : > { %3720 = vmatprep.subr.bf16.mxu1 %v4105_v48  ;;  %3742 = vmatprep.subr.bf16.mxu0 %v4106_v50 }
 0xd78   : > { %3721 = vmatpush3.bf16.msra.mxu1 %v4107_v51  ;;  %3743 = vmatpush3.bf16.msra.mxu0 %v4108_v49 }
 0xd79   : > { %3722 = vmatprep.subr.bf16.mxu1 %v4109_v53  ;;  %3744 = vmatprep.subr.bf16.mxu0 %v4110_v40 }
 0xd7c   : > { %3723 = vmatpush3.bf16.msra.mxu1 %v4111_v45  ;;  %3745 = vmatpush3.bf16.msra.mxu0 %v4112_v47 }
 0xd7d   : > { %3724 = vmatprep.subr.bf16.mxu1 %v4113_v55  ;;  %3746 = vmatprep.subr.bf16.mxu0 %v4114_v56 }
 0xd80   : > { %3725 = vmatpush3.bf16.msra.mxu1 %v4115_v57  ;;  %3747 = vmatpush3.bf16.msra.mxu0 %v4116_v58 }
 0xd81   : > { %3726 = vmatprep.subr.bf16.mxu1 %v4117_v59  ;;  %3748 = vmatprep.subr.bf16.mxu0 %v4118_v60 }
 0xd84   : > { %3727 = vmatpush3.bf16.msra.mxu1 %v4119_v61  ;;  %3749 = vmatpush3.bf16.msra.mxu0 %v4120_v62 }
 0xd85   : > { %3728 = vmatprep.subr.bf16.mxu1 %v4121_v44  ;;  %3750 = vmatprep.subr.bf16.mxu0 %v4122_v63 }
 0xd88   : > { %3729 = vmatpush3.bf16.msra.mxu1 %v4123_v0  ;;  %3751 = vmatpush3.bf16.msra.mxu0 %v4124_v1 }
 0xe3e   : > { %v2817_v10 = vpop.f32.mrb[28].mxu1  ;;  %v2860_v5 = vpop.f32.mrb[16].mxu0 }
 0xe3f   : > { %v2818_v11 = vadd.f32 %v2817_v10, %v2606_v6  ;;  %v2861_v12 = vadd.f32 %v2860_v5, %v2614_v7  ;;  %v2819_v13 = vpop.f32.mrb[29].mxu1  ;;  %v2862_v14 = vpop.f32.mrb[17].mxu0  ;;  %v3655_v5 = vld [vmem:[%s758_s23] ss:$0 sm:$0xff]  ;;  %s4401_s23 = scalar_lea.vmem %s3281_s22, 256 }
 0xe40   : > { %v2820_v15 = vadd.f32 %v2819_v13, %v2610_v8  ;;  %v2863_v16 = vadd.f32 %v2862_v14, %v2618_v9  ;;  %v2821_v17 = vpop.f32.mrb[30].mxu1  ;;  %v2864_v18 = vpop.f32.mrb[18].mxu0  ;;  %v3656_v14 = vld [vmem:[%s761_s6] ss:$0 sm:$0xff]  ;;  %p4402_p0 = scmp.ne.s32.totalorder %s3281_s22, %s4401_s23  ;;  %p4409_p7 = scmp.lt.s32.totalorder %s4401_s23, %s4401_s23 }
 0xe41   : > { %v2822_v19 = vadd.f32 %v2821_v17, %v2606_v6  ;;  %v2865_v20 = vadd.f32 %v2864_v18, %v2614_v7  ;;  %v2823_v35 = vpop.f32.mrb[31].mxu1  ;;  %v2866_v21 = vpop.f32.mrb[19].mxu0  ;;  %v2869_v23 = vmax.f32 %v2818_v11, 0.0  ;;  %v2871_v32 = vmax.f32 %v2861_v12, 0.0 }
 0xe42   : > { %v2824_v31 = vadd.f32 %v2823_v35, %v2610_v8  ;;  %v2867_v43 = vadd.f32 %v2866_v21, %v2618_v9  ;;  %v2870_v28 = vmax.f32 %v2820_v15, 0.0  ;;  %v2872_v30 = vmax.f32 %v2863_v16, 0.0  ;;  %p4403_p9 = pnand %p4402_p0, %p3937_p6  ;;  %p4410_p3 = por %p4409_p7, %p4408_p5 }
 0xe43   : > { %v2873_v33 = vmax.f32 %v2822_v19, 0.0  ;;  %v2875_v29 = vmax.f32 %v2865_v20, 0.0 }
 0xe44   : > { %v2874_v34 = vmax.f32 %v2824_v31, 0.0  ;;  %v2876_v36 = vmax.f32 %v2867_v43, 0.0  ;;  %p4404_p12 = pneg %p4403_p9 }
 0xe45   : > { %v2877_v25 = vpack.c.bf16 %v2873_v33, %v2869_v23  ;;  %v2879_v52 = vpack.c.bf16 %v2875_v29, %v2871_v32 }
 0xe46   : > { %v2878_v26 = vpack.c.bf16 %v2874_v34, %v2870_v28  ;;  %v2880_v4 = vpack.c.bf16 %v2876_v36, %v2872_v30  ;;  %p4411_p8 = pnand %p4410_p3, %p4404_p12 }
 0xe48   : > { %3176 = vmatprep.mubr.bf16.mxu1 %v2878_v26  ;;  %3217 = vmatprep.mubr.bf16.mxu0 %v2880_v4 }
 0xe49   : > { %3177 = vmatmul.mubr.bf16.vlgmr.msra.gmra.mrb[32].mxu1 %v2877_v25  ;;  %3218 = vmatmul.mubr.bf16.vlgmr.msra.gmra.mrb[20].mxu0 %v2879_v52 }
 0xf1c   : > { %v3730_v38 = vpop.f32.mrb[32].mxu1  ;;  %v3752_v22 = vpop.f32.mrb[20].mxu0 }
 0xf1d   : > { %v3731_v27 = vpop.f32.mrb[33].mxu1  ;;  %v3753_v39 = vpop.f32.mrb[21].mxu0 }
 0xf1e   : > { %v3732_v41 = vadd.f32 %v3731_v27, %v3730_v38  ;;  %v3754_v42 = vadd.f32 %v3753_v39, %v3752_v22  ;;  %v3733_v46 = vpop.f32.mrb[34].mxu1  ;;  %v3755_v48 = vpop.f32.mrb[22].mxu0 }
 0xf1f   : > { %v3734_v50 = vpop.f32.mrb[35].mxu1  ;;  %v3756_v51 = vpop.f32.mrb[23].mxu0 }
 0xf20   : > { %v3179_v49 = vadd.f32 %v3732_v41, %v3622_v24  ;;  %v3735_v53 = vadd.f32 %v3734_v50, %v3733_v46  ;;  %v3757_v40 = vadd.f32 %v3756_v51, %v3755_v48 }
 0xf22   : > { %v3220_v45 = vadd.f32 %v3754_v42, %v3179_v49  ;;  %v3182_v47 = vadd.f32 %v3735_v53, %v3622_v24 }
 0xf24   : > { %v3223_v55 = vadd.f32 %v3757_v40, %v3182_v47  ;;  %v3226_v56 = vadd.f32 %v3220_v45, %v5256_v54 }
 0xf26   : > { %3230 = vadd.xlane.f32.xlu1 %v3226_v56  ;;  %v3227_v57 = vadd.f32 %v3223_v55, %v5258_v37  ;;  %v3236_v58 = vmul.f32 %v3226_v56, %v3226_v56 }
 0xf28   : > { %3232 = vadd.xlane.f32.xlu0 %v3227_v57  ;;  %v3237_v59 = vmul.f32 %v3227_v57, %v3227_v57 }
 0xf2a   : > { %3238 = vadd.xlane.f32.xlu1 %v3236_v58 }
 0xf2c   : > { %3240 = vadd.xlane.f32.xlu0 %v3237_v59 }
 0xfb3   : > { %v3231_v60 = vpop.xlane.xlu1 %3230 }
 0xfb4   : > { %v3234_v61 = vmul.f32 0.0078125, %v3231_v60 }
 0xfb5   : > { %v3233_v62 = vpop.xlane.xlu0 %3232 }
 0xfb6   : > { %v3235_v44 = vmul.f32 0.0078125, %v3233_v62  ;;  %v3244_v0 = vmul.f32 %v3234_v61, %v3234_v61  ;;  %v3248_v9 = vsub.f32 %v3226_v56, %v3234_v61 }
 0xfb7   : > { %v3239_v63 = vpop.xlane.xlu1 %3238 }
 0xfb8   : > { %v3242_v1 = vmul.f32 0.0078125, %v3239_v63  ;;  %v3245_v3 = vmul.f32 %v3235_v44, %v3235_v44  ;;  %v3249_v11 = vsub.f32 %v3227_v57, %v3235_v44 }
 0xfb9   : > { %v3241_v2 = vpop.xlane.xlu0 %3240 }
 0xfba   : > { %v3246_v54 = vsub.f32 %v3242_v1, %v3244_v0  ;;  %v3243_v6 = vmul.f32 0.0078125, %v3241_v2 }
 0xfbc   : > { %v3250_v7 = vadd.f32 1e-05, %v3246_v54  ;;  %v3247_v37 = vsub.f32 %v3243_v6, %v3245_v3 }
 0xfbe   : > { %4161 = vrsqrt.f32 %v3250_v7  ;;  %v3251_v8 = vadd.f32 1e-05, %v3247_v37 }
 0xfc0   : > { %4163 = vrsqrt.f32 %v3251_v8 }
 0xfc8   : > { %v4162_v10 = vpop.eup %4161 }
 0xfc9   : > { %v3254_v12 = vmul.f32 %v4162_v10, %v3248_v9 }
 0xfca   : > { %v4164_v13 = vpop.eup %4163 }
 0xfcb   : > { %v3255_v15 = vmul.f32 %v4164_v13, %v3249_v11  ;;  %v3262_v16 = vmul.f32 %v3655_v5, %v3254_v12 }
 0xfcd   : > { %v3263_v17 = vmul.f32 %v3655_v5, %v3255_v15  ;;  %v3270_v18 = vadd.f32 %v3656_v14, %v3262_v16 }
 0xfcf   : > { %v3271_v19 = vadd.f32 %v3656_v14, %v3263_v17  ;;  %3272 = vst [vmem:[#allocation13] sm:$0xff] %v3270_v18 }
 0xfd1   : > { %3273 = vst [vmem:[#allocation13 + $0x8] sm:$0xff] %v3271_v19 }
 0xfd2   : > { %4414 = shalt.err (!%p4411_p8)
}
 0xfd3   : > { %s5444_s20 = sld [smem:[#allocation33_spill]] }
 0xfd9   : > { %s4415_s15 = scalar_lea.hbm %s5444_s20, 256 }
 0xfda   : > { %p4416_p4 = scmp.ne.s32.totalorder %s5444_s20, %s4415_s15  ;;  %p4421_p13 = scmp.lt.u32.totalorder %s4415_s15, %s5444_s20 }
 0xfdc   : > { %p4417_p11 = pnand %p4416_p4, %p3937_p6 }
 0xfde   : > { %p4418_p1 = pneg %p4417_p11 }
 0xfe0   : > { %p4423_p10 = pnand %p4421_p13, %p4418_p1 }
 0xfe2   : > { %4426 = shalt.err (!%p4423_p10)
}
 0xfe3   : > { %s4498_s1 = smov 128   ;;  %s4499_s4 = smov 8  }
 0xfe4   : > { %3903 = dma.vmem_to_hbm [thread:$0]  (%p3937_p6), %s3281_s22, 256, %s5444_s20, [#allocation4], %s4498_s1, %s4498_s1, %s4499_s4  }
 0xfe5   : > { %4456 = dma.done.wait (%p3937_p6), [#allocation4], 256  }
 0xfe6   : > { %4458 = vsyncadd (%p3937_p6), [#allocation4], 4294967040 }
 0xfe7 PF: > { %s5445_s16 = sld [smem:[#allocation19_spill]]  ;;  %s5446_s0 = sld [smem:[#allocation18_spill]] }
 0xfe8   : > { %s5447_s15 = sld [smem:[#allocation20_spill]]  ;;  %s5448_s29 = smov %s4465_s30 }
 0xfed   : > { %p24_p2 = scmp.ge.s32.totalorder %s5445_s16, 5   ;;  %s5449_s30 = smov %s5446_s0 }
 0xfef   :  { %26 = sbr.rel (!%p24_p2) target bundleno = 18 (0x12), region = 197 }
 0xff6   :  { %3296 = vsyncpa [#allocation3], 1 }
 0xff7   :  { %3298 = vsyncpa [#allocation3 + $0x1], 1 }
 0xff8   :  { %3299 = vsyncpa [#allocation6], 1 }
 0xff9   :  { %3300 = vsyncpa [#allocation4], 1 }
 0xffa   :  { %3302 = vsyncpa [#allocation4 + $0x1], 1 }

</bundles_post_ra>
